<compile_context>
chip_gen: v7x
topology: tpu7x:2x2x1
jax: 0.10.0
libtpu: 0.0.40
codegen_flags: <defaults>
</compile_context>

<pallas_src>
import functools

import jax
import jax.numpy as jnp
from jax import lax
from jax.experimental import pallas as pl
from jax.experimental.pallas import tpu as pltpu

F32 = jnp.float32
BF16 = jnp.bfloat16

# Stay below v7x's 64 MiB physical VMEM (v5e/v6e have 128 MiB) while lifting
# v5e's 16 MiB default scoped limit.
VMEM_LIMIT = 48 * 1024 * 1024


def _round_up(x, m):
    return (x + m - 1) // m * m


def _params(sem):
    return pltpu.CompilerParams(dimension_semantics=sem,
                                vmem_limit_bytes=VMEM_LIMIT)


# ---------------------------------------------------------------------------
# elementwise helpers used inside kernels
# ---------------------------------------------------------------------------
def _gelu(x):
    # TODO(synk): torch.nn.GELU() default is erf-exact; tanh approximation is
    # used for Mosaic-safe elementwise lowering (max abs diff ~1e-3).
    c = jnp.float32(0.7978845608028654)  # sqrt(2/pi)
    return 0.5 * x * (1.0 + jnp.tanh(c * (x + 0.044715 * x * x * x)))


def _sigmoid(x):
    return 1.0 / (1.0 + jnp.exp(-x))


# ---------------------------------------------------------------------------
# tiled matmul with fused bias / activation / residual epilogue
# ---------------------------------------------------------------------------
def _matmul_kernel(act, has_bias, has_res, *refs):
    a_ref, b_ref = refs[0], refs[1]
    idx = 2
    bias_ref = res_ref = None
    if has_bias:
        bias_ref = refs[idx]
        idx += 1
    if has_res:
        res_ref = refs[idx]
        idx += 1
    o_ref, acc_ref = refs[idx], refs[idx + 1]

    @pl.when(pl.program_id(2) == 0)
    def _():
        acc_ref[...] = jnp.zeros_like(acc_ref)

    # bf16 MXU operands, f32 accumulation.
    acc_ref[...] += jnp.dot(a_ref[...].astype(BF16), b_ref[...].astype(BF16),
                            preferred_element_type=jnp.float32)

    @pl.when(pl.program_id(2) == pl.num_programs(2) - 1)
    def _():
        y = acc_ref[...]
        if has_bias:
            y = y + bias_ref[...]
        if act == "gelu":
            y = _gelu(y)
        elif act == "sigmoid":
            y = _sigmoid(y)
        if has_res:
            y = y + res_ref[...]
        o_ref[...] = y


def _pad2(x, rows, cols):
    r, c = x.shape
    if rows == r and cols == c:
        return x
    return jnp.pad(x, ((0, rows - r), (0, cols - c)))


def pallas_matmul(a, b, bias=None, act=None, residual=None):
    """(M,K)@(K,N) (+bias +activation +residual) as a tiled/pipelined kernel."""
    M, K = a.shape
    N = b.shape[1]

    tm = 256 if M > 256 else _round_up(M, 8)
    Mp = _round_up(M, tm)
    tk = 512 if K > 512 else K
    Kp = _round_up(K, tk)
    if N % 128 == 0:
        tn = 256 if N % 256 == 0 else 128
        Np = N
    elif N <= 512:
        tn, Np = N, N
    else:
        tn = 128
        Np = _round_up(N, tn)

    operands = [_pad2(a.astype(F32), Mp, Kp), _pad2(b.astype(F32), Kp, Np)]
    in_specs = [pl.BlockSpec((tm, tk), lambda i, j, k: (i, k)),
                pl.BlockSpec((tk, tn), lambda i, j, k: (k, j))]
    if bias is not None:
        operands.append(_pad2(bias.reshape(1, N).astype(F32), 1, Np))
        in_specs.append(pl.BlockSpec((1, tn), lambda i, j, k: (0, j)))
    if residual is not None:
        operands.append(_pad2(residual.astype(F32), Mp, Np))
        in_specs.append(pl.BlockSpec((tm, tn), lambda i, j, k: (i, j)))

    out = pl.pallas_call(
        functools.partial(_matmul_kernel, act, bias is not None,
                          residual is not None),
        out_shape=jax.ShapeDtypeStruct((Mp, Np), F32),
        grid=(Mp // tm, Np // tn, Kp // tk),
        in_specs=in_specs,
        out_specs=pl.BlockSpec((tm, tn), lambda i, j, k: (i, j)),
        scratch_shapes=[pltpu.VMEM((tm, tn), jnp.float32)],
        compiler_params=_params(("parallel", "parallel", "arbitrary")),
    )(*operands)
    if (Mp, Np) != (M, N):
        out = out[:M, :N]
    return out


# ---------------------------------------------------------------------------
# two-pass tiled BatchNorm (training-mode batch statistics) and LayerNorm
# ---------------------------------------------------------------------------
def _bn_stats_kernel(x_ref, sum_ref, sq_ref):
    @pl.when(pl.program_id(0) == 0)
    def _():
        sum_ref[...] = jnp.zeros_like(sum_ref)
        sq_ref[...] = jnp.zeros_like(sq_ref)

    x = x_ref[...].astype(jnp.float32)
    sum_ref[...] += jnp.sum(x, axis=0, keepdims=True)
    sq_ref[...] += jnp.sum(x * x, axis=0, keepdims=True)


def _row_tile(M):
    tr = 256 if M > 256 else _round_up(M, 8)
    return tr, _round_up(M, tr)


def bn_stats(x2d):
    """Per-channel sum / sum-of-squares over rows (tiled grid reduction)."""
    M, C = x2d.shape
    tr, Mp = _row_tile(M)
    xp = x2d if Mp == M else jnp.pad(x2d, ((0, Mp - M), (0, 0)))
    return pl.pallas_call(
        _bn_stats_kernel,
        out_shape=(jax.ShapeDtypeStruct((1, C), F32),
                   jax.ShapeDtypeStruct((1, C), F32)),
        grid=(Mp // tr,),
        in_specs=[pl.BlockSpec((tr, C), lambda i: (i, 0))],
        out_specs=(pl.BlockSpec((1, C), lambda i: (0, 0)),
                   pl.BlockSpec((1, C), lambda i: (0, 0))),
        compiler_params=_params(("arbitrary",)),
    )(xp.astype(F32))


def _bn_apply_kernel(count, eps, apply_gelu, x_ref, sum_ref, sq_ref, g_ref,
                     b_ref, o_ref):
    mean = sum_ref[...] * (1.0 / count)
    var = jnp.maximum(sq_ref[...] * (1.0 / count) - mean * mean, 0.0)
    scale = g_ref[...] * lax.rsqrt(var + eps)
    shift = b_ref[...] - mean * scale
    y = x_ref[...] * scale + shift
    if apply_gelu:
        y = _gelu(y)
    o_ref[...] = y


def batchnorm_nhwc(x, bn, apply_gelu=False, eps=1e-5):
    # TODO(synk): BatchNorm2d uses per-call batch statistics (training mode,
    # biased variance); eval-mode running statistics are not modeled.
    B, H, W, C = x.shape
    M = B * H * W
    x2d = x.reshape(M, C)
    s, sq = bn_stats(x2d)
    tr, Mp = _row_tile(M)
    xp = x2d if Mp == M else jnp.pad(x2d, ((0, Mp - M), (0, 0)))
    y = pl.pallas_call(
        functools.partial(_bn_apply_kernel, float(M), eps, apply_gelu),
        out_shape=jax.ShapeDtypeStruct((Mp, C), F32),
        grid=(Mp // tr,),
        in_specs=[pl.BlockSpec((tr, C), lambda i: (i, 0)),
                  pl.BlockSpec((1, C), lambda i: (0, 0)),
                  pl.BlockSpec((1, C), lambda i: (0, 0)),
                  pl.BlockSpec((1, C), lambda i: (0, 0)),
                  pl.BlockSpec((1, C), lambda i: (0, 0))],
        out_specs=pl.BlockSpec((tr, C), lambda i: (i, 0)),
        compiler_params=_params(("parallel",)),
    )(xp.astype(F32), s, sq, bn["g"].reshape(1, C).astype(F32),
      bn["b"].reshape(1, C).astype(F32))
    if Mp != M:
        y = y[:M]
    return y.reshape(B, H, W, C)


def _ln_kernel(eps, x_ref, g_ref, b_ref, o_ref):
    x = x_ref[...]
    mean = jnp.mean(x, axis=-1, keepdims=True)
    var = jnp.mean(jnp.square(x - mean), axis=-1, keepdims=True)
    o_ref[...] = (x - mean) * lax.rsqrt(var + eps) * g_ref[...] + b_ref[...]


def pallas_layernorm(x2d, gamma, beta, eps=1e-5):
    M, C = x2d.shape
    tr, Mp = _row_tile(M)
    xp = x2d if Mp == M else jnp.pad(x2d, ((0, Mp - M), (0, 0)))
    y = pl.pallas_call(
        functools.partial(_ln_kernel, eps),
        out_shape=jax.ShapeDtypeStruct((Mp, C), F32),
        grid=(Mp // tr,),
        in_specs=[pl.BlockSpec((tr, C), lambda i: (i, 0)),
                  pl.BlockSpec((1, C), lambda i: (0, 0)),
                  pl.BlockSpec((1, C), lambda i: (0, 0))],
        out_specs=pl.BlockSpec((tr, C), lambda i: (i, 0)),
        compiler_params=_params(("parallel",)),
    )(xp.astype(F32), gamma.reshape(1, C).astype(F32),
      beta.reshape(1, C).astype(F32))
    return y[:M] if Mp != M else y


# ---------------------------------------------------------------------------
# 3x3 convs: 9-tap accumulation inside the kernel (no im2col in HBM)
# ---------------------------------------------------------------------------
def _conv3x3_kernel(Wp, Mv, act, x_ref, w_ref, b_ref, o_ref):
    cout = w_ref.shape[-1]
    acc = jnp.zeros((Mv, cout), jnp.float32)
    for di in range(3):
        for dj in range(3):
            off = di * Wp + dj
            a = x_ref[0, off:off + Mv, :].astype(BF16)
            acc = acc + jnp.dot(a, w_ref[3 * di + dj].astype(BF16),
                                preferred_element_type=jnp.float32)
    acc = acc + b_ref[...]
    if act == "gelu":
        acc = _gelu(acc)
    o_ref[0] = acc


def conv3x3(x, w, b, stride=1, act=None):
    """3x3 conv, padding=1 ('same' for stride 1), NHWC.  The 9-tap MAC runs in
    the kernel on a flattened (Hp*Wp, Cin) slab; stride-2 computes the stride-1
    output and subsamples (elementwise epilogue commutes with subsampling)."""
    B, H, W, Cin = x.shape
    Cout = w.shape[-1]
    Hp, Wp = H + 2, W + 2
    Mv = (H - 1) * Wp + W
    x_flat = jnp.pad(x, ((0, 0), (1, 1), (1, 1), (0, 0))).reshape(B, Hp * Wp, Cin)
    y = pl.pallas_call(
        functools.partial(_conv3x3_kernel, Wp, Mv, act),
        out_shape=jax.ShapeDtypeStruct((B, Mv, Cout), F32),
        grid=(B,),
        in_specs=[pl.BlockSpec((1, Hp * Wp, Cin), lambda i: (i, 0, 0)),
                  pl.BlockSpec((9, Cin, Cout), lambda i: (0, 0, 0)),
                  pl.BlockSpec((1, Cout), lambda i: (0, 0))],
        out_specs=pl.BlockSpec((1, Mv, Cout), lambda i: (i, 0, 0)),
        compiler_params=_params(("parallel",)),
    )(x_flat.astype(F32), w.reshape(9, Cin, Cout).astype(F32),
      b.reshape(1, Cout).astype(F32))
    # glue: pad the ragged tail, drop the 2 padding columns, apply the stride.
    y = jnp.pad(y, ((0, 0), (0, H * Wp - Mv), (0, 0)))
    y = y.reshape(B, H, Wp, Cout)[:, :, :W, :]
    if stride > 1:
        y = y[:, ::stride, ::stride, :]
    return y


def _dw_kernel(Wp, Mv, x_ref, w_ref, o_ref):
    acc = x_ref[0, 0:Mv, :] * w_ref[0:1, :]
    for tap in range(1, 9):
        di, dj = tap // 3, tap % 3
        off = di * Wp + dj
        acc = acc + x_ref[0, off:off + Mv, :] * w_ref[tap:tap + 1, :]
    o_ref[0] = acc


def depthwise_conv3x3(x, w, stride):
    """Bias-free 3x3 depthwise conv (BN follows), 9-tap MAC inside the kernel."""
    B, H, W, C = x.shape
    Hp, Wp = H + 2, W + 2
    Mv = (H - 1) * Wp + W
    x_flat = jnp.pad(x, ((0, 0), (1, 1), (1, 1), (0, 0))).reshape(B, Hp * Wp, C)
    y = pl.pallas_call(
        functools.partial(_dw_kernel, Wp, Mv),
        out_shape=jax.ShapeDtypeStruct((B, Mv, C), F32),
        grid=(B,),
        in_specs=[pl.BlockSpec((1, Hp * Wp, C), lambda i: (i, 0, 0)),
                  pl.BlockSpec((9, C), lambda i: (0, 0))],
        out_specs=pl.BlockSpec((1, Mv, C), lambda i: (i, 0, 0)),
        compiler_params=_params(("parallel",)),
    )(x_flat.astype(F32), w.reshape(9, C).astype(F32))
    y = jnp.pad(y, ((0, 0), (0, H * Wp - Mv), (0, 0)))
    y = y.reshape(B, H, Wp, C)[:, :, :W, :]
    if stride > 1:
        y = y[:, ::stride, ::stride, :]
    return y


# ---------------------------------------------------------------------------
# fused squeeze-excitation (pool -> FC+GELU -> FC+sigmoid -> gate) per batch
# ---------------------------------------------------------------------------
def _se_kernel(inv_l, a_ref, rw_ref, rb_ref, ew_ref, eb_ref, o_ref):
    a = a_ref[0]                                             # (L, Cm) f32
    pooled = jnp.sum(a, axis=0, keepdims=True) * inv_l       # (1, Cm)
    pooled8 = jnp.broadcast_to(pooled, (8, pooled.shape[1]))
    g = _gelu(jnp.dot(pooled8, rw_ref[...],
                      preferred_element_type=jnp.float32) + rb_ref[...])
    g = _sigmoid(jnp.dot(g, ew_ref[...],
                         preferred_element_type=jnp.float32) + eb_ref[...])
    o_ref[0] = a * g[0:1, :]


def se_block(h, p):
    B, H, W, Cm = h.shape
    L = H * W
    rw, ew = p["se_red_w"], p["se_exp_w"]
    sq = rw.shape[1]
    out = pl.pallas_call(
        functools.partial(_se_kernel, 1.0 / L),
        out_shape=jax.ShapeDtypeStruct((B, L, Cm), F32),
        grid=(B,),
        in_specs=[pl.BlockSpec((1, L, Cm), lambda i: (i, 0, 0)),
                  pl.BlockSpec((Cm, sq), lambda i: (0, 0)),
                  pl.BlockSpec((1, sq), lambda i: (0, 0)),
                  pl.BlockSpec((sq, Cm), lambda i: (0, 0)),
                  pl.BlockSpec((1, Cm), lambda i: (0, 0))],
        out_specs=pl.BlockSpec((1, L, Cm), lambda i: (i, 0, 0)),
        compiler_params=_params(("parallel",)),
    )(h.reshape(B, L, Cm).astype(F32), rw.astype(F32),
      p["se_red_b"].reshape(1, sq).astype(F32), ew.astype(F32),
      p["se_exp_b"].reshape(1, Cm).astype(F32))
    return out.reshape(B, H, W, Cm)


# ---------------------------------------------------------------------------
# multi-head self-attention, all heads of one batch element per grid step
# ---------------------------------------------------------------------------
def _attn_kernel(q_ref, k_ref, v_ref, o_ref):
    # TODO(synk): WindowAttention (pe_type=LePE_ADD) source was not provided;
    # standard scaled dot-product MHSA is implemented (scale folded into q).
    q = q_ref[0].astype(BF16)
    k = k_ref[0].astype(BF16)
    v = v_ref[0].astype(BF16)
    s = jnp.einsum("hqd,hkd->hqk", q, k, preferred_element_type=jnp.float32)
    s = s - jnp.max(s, axis=-1, keepdims=True)
    p = jnp.exp(s)
    inv = pl.reciprocal(jnp.sum(p, axis=-1, keepdims=True), approx=True)
    o = jnp.einsum("hqk,hkd->hqd", p.astype(BF16), v,
                   preferred_element_type=jnp.float32)
    o_ref[0] = o * inv


def pallas_attention(q, k, v):
    """q,k,v: (B, num_heads, L, head_dim); grid over batch, megacore-parallel."""
    B, nh, L, hd = q.shape
    spec = pl.BlockSpec((1, nh, L, hd), lambda i: (i, 0, 0, 0))
    return pl.pallas_call(
        _attn_kernel,
        out_shape=jax.ShapeDtypeStruct((B, nh, L, hd), F32),
        grid=(B,),
        in_specs=[spec, spec, spec],
        out_specs=spec,
        compiler_params=_params(("parallel",)),
    )(q.astype(F32), k.astype(F32), v.astype(F32))


# ---------------------------------------------------------------------------
# deterministic parameter initialization
# ---------------------------------------------------------------------------
class ParamGen:
    def __init__(self, seed=0):
        self.key = jax.random.PRNGKey(seed)

    def normal(self, shape, std=0.02):
        self.key, sub = jax.random.split(self.key)
        return jax.random.normal(sub, shape, F32) * std


def _bn_params(c):
    return {"g": jnp.ones((c,), F32), "b": jnp.zeros((c,), F32)}


def init_mbconv_params(pg, in_ch, out_ch, expand, stride, se_ratio):
    mid = in_ch * expand
    p = {"type": "mbconv", "in": in_ch, "out": out_ch, "stride": stride,
         "se_ratio": se_ratio}
    p["pre_bn"] = _bn_params(in_ch)
    p["expand_w"] = pg.normal((1, 1, in_ch, mid))
    p["bn1"] = _bn_params(mid)
    p["dw_w"] = pg.normal((3, 3, mid))
    p["bn2"] = _bn_params(mid)
    if se_ratio:
        sq = max(1, int(in_ch * se_ratio))
        p["se_red_w"] = pg.normal((mid, sq))
        p["se_red_b"] = jnp.zeros((sq,), F32)
        p["se_exp_w"] = pg.normal((sq, mid))
        p["se_exp_b"] = jnp.zeros((mid,), F32)
    p["proj_w"] = pg.normal((1, 1, mid, out_ch))
    if stride != 1 or in_ch != out_ch:
        p["short_w"] = pg.normal((1, 1, in_ch, out_ch))
        p["short_b"] = jnp.zeros((out_ch,), F32)
    return p


def init_moat_params(pg, in_ch, out_ch, expand, stride, head_dim):
    p = {"type": "moat", "in": in_ch, "out": out_ch, "stride": stride,
         "head_dim": head_dim}
    p["mbconv"] = init_mbconv_params(pg, in_ch, out_ch, expand, stride, None)
    p["ln_g"] = jnp.ones((out_ch,), F32)
    p["ln_b"] = jnp.zeros((out_ch,), F32)
    p["qkv_w"] = pg.normal((out_ch, 3 * out_ch))
    p["qkv_b"] = jnp.zeros((3 * out_ch,), F32)
    p["proj_w"] = pg.normal((out_ch, out_ch))
    p["proj_b"] = jnp.zeros((out_ch,), F32)
    return p


def init_moat_model(seed, cfg):
    pg = ParamGen(seed)
    params = {
        "stem": {
            "conv0_w": pg.normal((3, 3, 3, cfg["stem_size"][0])),
            "conv0_b": jnp.zeros((cfg["stem_size"][0],), F32),
            "bn0": _bn_params(cfg["stem_size"][0]),
            "conv1_w": pg.normal((3, 3, cfg["stem_size"][0], cfg["stem_size"][1])),
            "conv1_b": jnp.zeros((cfg["stem_size"][1],), F32),
        }
    }
    stages = []
    for stage_id, btype in enumerate(cfg["block_type"]):
        stage_in = cfg["hidden_size"][stage_id - 1] if stage_id > 0 else cfg["stem_size"][-1]
        stage_out = cfg["hidden_size"][stage_id]
        blocks = []
        for local_id in range(cfg["num_blocks"][stage_id]):
            stride = cfg["stage_stride"][stage_id] if local_id == 0 else 1
            in_ch = stage_in if local_id == 0 else stage_out
            if btype == "mbconv":
                blocks.append(init_mbconv_params(
                    pg, in_ch, stage_out, cfg["mbconv_expand"], stride, 0.25))
            elif btype == "moat":
                blocks.append(init_moat_params(
                    pg, in_ch, stage_out, cfg["moat_expand"], stride, cfg["head_dim"]))
            else:
                raise ValueError(btype)
        stages.append(blocks)
    params["stages"] = stages
    return params


# ---------------------------------------------------------------------------
# forward passes
# ---------------------------------------------------------------------------
def mbconv_forward(p, x):
    # TODO(synk): MBConvBlock source was not provided; reconstructed as the
    # standard MOAT pre-norm MBConv (pre-BN -> 1x1 expand -> BN+GELU ->
    # 3x3 depthwise -> BN+GELU -> [SE] -> 1x1 project -> residual, with an
    # avg-pool + 1x1-conv shortcut when downsampling / changing channels).
    in_ch, out_ch, stride, se_ratio = p["in"], p["out"], p["stride"], p["se_ratio"]
    B, H, W, _ = x.shape
    shortcut = x
    M = B * H * W
    x2d = x.reshape(M, in_ch)

    # pre-BN folded exactly into the 1x1 expand conv (per-channel affine):
    # W' = scale * W, b' = shift @ W  -> saves a full activation pass.
    s, sq = bn_stats(x2d)
    mean = s / M
    var = jnp.maximum(sq / M - mean * mean, 0.0)
    scale = p["pre_bn"]["g"].reshape(1, in_ch) * lax.rsqrt(var + 1e-5)
    shift = p["pre_bn"]["b"].reshape(1, in_ch) - mean * scale
    w_exp = p["expand_w"].reshape(in_ch, -1)
    mid = w_exp.shape[1]
    h = pallas_matmul(x2d, w_exp * scale.reshape(in_ch, 1), bias=(shift @ w_exp))
    h = h.reshape(B, H, W, mid)

    h = batchnorm_nhwc(h, p["bn1"], apply_gelu=True)
    h = depthwise_conv3x3(h, p["dw_w"], stride)
    h = batchnorm_nhwc(h, p["bn2"], apply_gelu=True)
    if se_ratio:
        h = se_block(h, p)

    Ho, Wo = h.shape[1], h.shape[2]
    L2 = B * Ho * Wo
    h2d = h.reshape(L2, mid)
    w_proj = p["proj_w"].reshape(mid, out_ch)

    if stride == 1 and in_ch == out_ch:
        # residual add fused into the projection matmul epilogue.
        out = pallas_matmul(h2d, w_proj, residual=shortcut.reshape(L2, out_ch))
        return out.reshape(B, Ho, Wo, out_ch)

    proj = pallas_matmul(h2d, w_proj)
    # shortcut branch: [stride x stride avg-pool] -> 1x1 conv (bias); the pool is
    # folded into a phase-concat matmul and the residual add is fused in.
    if stride != 1:
        phases = [shortcut[:, i::stride, j::stride, :]
                  for i in range(stride) for j in range(stride)]
        s_in = jnp.concatenate(phases, axis=-1).reshape(L2, stride * stride * in_ch)
        w_short = jnp.concatenate(
            [p["short_w"].reshape(in_ch, out_ch)] * (stride * stride), axis=0)
        w_short = w_short / float(stride * stride)
    else:
        s_in = shortcut.reshape(L2, in_ch)
        w_short = p["short_w"].reshape(in_ch, out_ch)
    out = pallas_matmul(s_in, w_short, bias=p["short_b"], residual=proj)
    return out.reshape(B, Ho, Wo, out_ch)


def moat_block_forward(p, x):
    h = mbconv_forward(p["mbconv"], x)
    B, H, W, C = h.shape
    L = H * W
    shortcut = h.reshape(B * L, C)
    hl = pallas_layernorm(shortcut, p["ln_g"], p["ln_b"])

    head_dim = p["head_dim"]
    nh = C // head_dim
    scale = head_dim ** -0.5
    # fold the 1/sqrt(d) attention scale into the q third of the qkv projection.
    qkv_w = jnp.concatenate([p["qkv_w"][:, :C] * scale, p["qkv_w"][:, C:]], axis=1)
    qkv_b = jnp.concatenate([p["qkv_b"][:C] * scale, p["qkv_b"][C:]], axis=0)
    qkv = pallas_matmul(hl, qkv_w, qkv_b)                          # (B*L, 3C)
    qkv = qkv.reshape(B, L, 3, nh, head_dim).transpose(2, 0, 3, 1, 4)
    attn = pallas_attention(qkv[0], qkv[1], qkv[2])                # (B, nh, L, hd)
    attn = attn.transpose(0, 2, 1, 3).reshape(B * L, C)
    # output projection with the residual add fused into the epilogue.
    out = pallas_matmul(attn, p["proj_w"], p["proj_b"], residual=shortcut)
    return out.reshape(B, H, W, C)


def moat_forward(params, x_nchw, out_indices=(0, 1)):
    # layout: NCHW in (PyTorch) -> NHWC internally -> NCHW outputs.
    x = jnp.transpose(x_nchw, (0, 2, 3, 1)).astype(F32)
    p = params["stem"]
    # Stem: conv(s=2, pad=1, bias) -> GELU -> BatchNorm, then conv(s=1, same, bias)
    h = conv3x3(x, p["conv0_w"], p["conv0_b"], stride=2, act="gelu")
    h = batchnorm_nhwc(h, p["bn0"], apply_gelu=False)
    h = conv3x3(h, p["conv1_w"], p["conv1_b"], stride=1)
    outs = []
    for stage_id, stage in enumerate(params["stages"]):
        for blk in stage:
            if blk["type"] == "mbconv":
                h = mbconv_forward(blk, h)
            else:
                h = moat_block_forward(blk, h)
        if stage_id in out_indices:
            outs.append(jnp.transpose(h, (0, 3, 1, 2)))            # back to NCHW
    return outs


# ---------------------------------------------------------------------------
if __name__ == "__main__":
    # small MOAT config: 2 stages (mbconv, moat), one block each
    cfg = dict(
        stem_size=(16, 16),
        block_type=("mbconv", "moat"),
        num_blocks=(1, 1),
        hidden_size=(16, 32),
        stage_stride=(2, 2),
        mbconv_expand=4,
        moat_expand=4,
        head_dim=32,            # dim=32 -> 1 head, satisfies C % 32 == 0
        attention_mode="global",
    )
    params = init_moat_model(0, cfg)

    key = jax.random.PRNGKey(0)
    x = jax.random.normal(key, (2, 3, 16, 16), F32)   # NCHW like PyTorch

    outs = moat_forward(params, x, out_indices=(0, 1))
    outs = jax.block_until_ready(outs)

    assert outs[0].shape == (2, 16, 4, 4), outs[0].shape
    assert outs[1].shape == (2, 32, 2, 2), outs[1].shape
    assert all(bool(jnp.all(jnp.isfinite(o))) for o in outs)
    print("KERNEL_OK")
</pallas_src>

<mosaic_0001>
module attributes {stable_mosaic.version = 11 : i64} {
  func.func @_conv3x3_kernel(%arg0: i32, %arg1: memref<1x324x3xf32, #tpu.memory_space<vmem>>, %arg2: memref<9x3x16xf32, #tpu.memory_space<vmem>>, %arg3: memref<1x16xf32, #tpu.memory_space<vmem>>, %arg4: memref<1x286x16xf32, #tpu.memory_space<vmem>>) attributes {dimension_semantics = [#tpu.dimension_semantics<parallel>], iteration_bounds = array<i64: 2>, scalar_prefetch = 0 : i64, scratch_operands = 0 : i64, tpu.core_type = #tpu.core_type<tc>, window_params = [{transform_indices = @transform_0, window_bounds = array<i64: 1, 324, 3>}, {pipeline_mode = #tpu.pipeline_mode<synchronous>, transform_indices = @transform_1, window_bounds = array<i64: 9, 3, 16>}, {pipeline_mode = #tpu.pipeline_mode<synchronous>, transform_indices = @transform_2, window_bounds = array<i64: 1, 16>}, {transform_indices = @transform_3, window_bounds = array<i64: 1, 286, 16>}]} {
    %cst = arith.constant 0.000000e+00 : f32
    %0 = vector.broadcast %cst : f32 to vector<286x16xf32>
    %c0 = arith.constant 0 : index
    %c0_0 = arith.constant 0 : index
    %c0_1 = arith.constant 0 : index
    %1 = vector.load %arg1[%c0, %c0_0, %c0_1] : memref<1x324x3xf32, #tpu.memory_space<vmem>>, vector<1x286x3xf32>
    %2 = vector.shape_cast %1 : vector<1x286x3xf32> to vector<286x3xf32>
    %3 = arith.truncf %2 : vector<286x3xf32> to vector<286x3xbf16>
    %c0_2 = arith.constant 0 : index
    %c0_3 = arith.constant 0 : index
    %c0_4 = arith.constant 0 : index
    %4 = vector.load %arg2[%c0_2, %c0_3, %c0_4] : memref<9x3x16xf32, #tpu.memory_space<vmem>>, vector<1x3x16xf32>
    %5 = vector.shape_cast %4 : vector<1x3x16xf32> to vector<3x16xf32>
    %6 = arith.truncf %5 : vector<3x16xf32> to vector<3x16xbf16>
    %cst_5 = arith.constant dense<0.000000e+00> : vector<286x16xf32>
    %7 = tpu.matmul %3, %6, %cst_5 {dimension_numbers = #tpu.dot_dimension_numbers<[1], [0], [0], [1], [0, 0, 1, 1], [], []>} : vector<286x3xbf16>, vector<3x16xbf16>, vector<286x16xf32> -> vector<286x16xf32>
    %8 = arith.addf %0, %7 : vector<286x16xf32>
    %c0_6 = arith.constant 0 : index
    %c1 = arith.constant 1 : index
    %c0_7 = arith.constant 0 : index
    %9 = vector.load %arg1[%c0_6, %c1, %c0_7] : memref<1x324x3xf32, #tpu.memory_space<vmem>>, vector<1x286x3xf32>
    %10 = vector.shape_cast %9 : vector<1x286x3xf32> to vector<286x3xf32>
    %11 = arith.truncf %10 : vector<286x3xf32> to vector<286x3xbf16>
    %c1_8 = arith.constant 1 : index
    %c0_9 = arith.constant 0 : index
    %c0_10 = arith.constant 0 : index
    %12 = vector.load %arg2[%c1_8, %c0_9, %c0_10] : memref<9x3x16xf32, #tpu.memory_space<vmem>>, vector<1x3x16xf32>
    %13 = vector.shape_cast %12 : vector<1x3x16xf32> to vector<3x16xf32>
    %14 = arith.truncf %13 : vector<3x16xf32> to vector<3x16xbf16>
    %cst_11 = arith.constant dense<0.000000e+00> : vector<286x16xf32>
    %15 = tpu.matmul %11, %14, %cst_11 {dimension_numbers = #tpu.dot_dimension_numbers<[1], [0], [0], [1], [0, 0, 1, 1], [], []>} : vector<286x3xbf16>, vector<3x16xbf16>, vector<286x16xf32> -> vector<286x16xf32>
    %16 = arith.addf %8, %15 : vector<286x16xf32>
    %c0_12 = arith.constant 0 : index
    %c2 = arith.constant 2 : index
    %c0_13 = arith.constant 0 : index
    %17 = vector.load %arg1[%c0_12, %c2, %c0_13] : memref<1x324x3xf32, #tpu.memory_space<vmem>>, vector<1x286x3xf32>
    %18 = vector.shape_cast %17 : vector<1x286x3xf32> to vector<286x3xf32>
    %19 = arith.truncf %18 : vector<286x3xf32> to vector<286x3xbf16>
    %c2_14 = arith.constant 2 : index
    %c0_15 = arith.constant 0 : index
    %c0_16 = arith.constant 0 : index
    %20 = vector.load %arg2[%c2_14, %c0_15, %c0_16] : memref<9x3x16xf32, #tpu.memory_space<vmem>>, vector<1x3x16xf32>
    %21 = vector.shape_cast %20 : vector<1x3x16xf32> to vector<3x16xf32>
    %22 = arith.truncf %21 : vector<3x16xf32> to vector<3x16xbf16>
    %cst_17 = arith.constant dense<0.000000e+00> : vector<286x16xf32>
    %23 = tpu.matmul %19, %22, %cst_17 {dimension_numbers = #tpu.dot_dimension_numbers<[1], [0], [0], [1], [0, 0, 1, 1], [], []>} : vector<286x3xbf16>, vector<3x16xbf16>, vector<286x16xf32> -> vector<286x16xf32>
    %24 = arith.addf %16, %23 : vector<286x16xf32>
    %c0_18 = arith.constant 0 : index
    %c18 = arith.constant 18 : index
    %c0_19 = arith.constant 0 : index
    %25 = vector.load %arg1[%c0_18, %c18, %c0_19] : memref<1x324x3xf32, #tpu.memory_space<vmem>>, vector<1x286x3xf32>
    %26 = vector.shape_cast %25 : vector<1x286x3xf32> to vector<286x3xf32>
    %27 = arith.truncf %26 : vector<286x3xf32> to vector<286x3xbf16>
    %c3 = arith.constant 3 : index
    %c0_20 = arith.constant 0 : index
    %c0_21 = arith.constant 0 : index
    %28 = vector.load %arg2[%c3, %c0_20, %c0_21] : memref<9x3x16xf32, #tpu.memory_space<vmem>>, vector<1x3x16xf32>
    %29 = vector.shape_cast %28 : vector<1x3x16xf32> to vector<3x16xf32>
    %30 = arith.truncf %29 : vector<3x16xf32> to vector<3x16xbf16>
    %cst_22 = arith.constant dense<0.000000e+00> : vector<286x16xf32>
    %31 = tpu.matmul %27, %30, %cst_22 {dimension_numbers = #tpu.dot_dimension_numbers<[1], [0], [0], [1], [0, 0, 1, 1], [], []>} : vector<286x3xbf16>, vector<3x16xbf16>, vector<286x16xf32> -> vector<286x16xf32>
    %32 = arith.addf %24, %31 : vector<286x16xf32>
    %c0_23 = arith.constant 0 : index
    %c19 = arith.constant 19 : index
    %c0_24 = arith.constant 0 : index
    %33 = vector.load %arg1[%c0_23, %c19, %c0_24] : memref<1x324x3xf32, #tpu.memory_space<vmem>>, vector<1x286x3xf32>
    %34 = vector.shape_cast %33 : vector<1x286x3xf32> to vector<286x3xf32>
    %35 = arith.truncf %34 : vector<286x3xf32> to vector<286x3xbf16>
    %c4 = arith.constant 4 : index
    %c0_25 = arith.constant 0 : index
    %c0_26 = arith.constant 0 : index
    %36 = vector.load %arg2[%c4, %c0_25, %c0_26] : memref<9x3x16xf32, #tpu.memory_space<vmem>>, vector<1x3x16xf32>
    %37 = vector.shape_cast %36 : vector<1x3x16xf32> to vector<3x16xf32>
    %38 = arith.truncf %37 : vector<3x16xf32> to vector<3x16xbf16>
    %cst_27 = arith.constant dense<0.000000e+00> : vector<286x16xf32>
    %39 = tpu.matmul %35, %38, %cst_27 {dimension_numbers = #tpu.dot_dimension_numbers<[1], [0], [0], [1], [0, 0, 1, 1], [], []>} : vector<286x3xbf16>, vector<3x16xbf16>, vector<286x16xf32> -> vector<286x16xf32>
    %40 = arith.addf %32, %39 : vector<286x16xf32>
    %c0_28 = arith.constant 0 : index
    %c20 = arith.constant 20 : index
    %c0_29 = arith.constant 0 : index
    %41 = vector.load %arg1[%c0_28, %c20, %c0_29] : memref<1x324x3xf32, #tpu.memory_space<vmem>>, vector<1x286x3xf32>
    %42 = vector.shape_cast %41 : vector<1x286x3xf32> to vector<286x3xf32>
    %43 = arith.truncf %42 : vector<286x3xf32> to vector<286x3xbf16>
    %c5 = arith.constant 5 : index
    %c0_30 = arith.constant 0 : index
    %c0_31 = arith.constant 0 : index
    %44 = vector.load %arg2[%c5, %c0_30, %c0_31] : memref<9x3x16xf32, #tpu.memory_space<vmem>>, vector<1x3x16xf32>
    %45 = vector.shape_cast %44 : vector<1x3x16xf32> to vector<3x16xf32>
    %46 = arith.truncf %45 : vector<3x16xf32> to vector<3x16xbf16>
    %cst_32 = arith.constant dense<0.000000e+00> : vector<286x16xf32>
    %47 = tpu.matmul %43, %46, %cst_32 {dimension_numbers = #tpu.dot_dimension_numbers<[1], [0], [0], [1], [0, 0, 1, 1], [], []>} : vector<286x3xbf16>, vector<3x16xbf16>, vector<286x16xf32> -> vector<286x16xf32>
    %48 = arith.addf %40, %47 : vector<286x16xf32>
    %c0_33 = arith.constant 0 : index
    %c36 = arith.constant 36 : index
    %c0_34 = arith.constant 0 : index
    %49 = vector.load %arg1[%c0_33, %c36, %c0_34] : memref<1x324x3xf32, #tpu.memory_space<vmem>>, vector<1x286x3xf32>
    %50 = vector.shape_cast %49 : vector<1x286x3xf32> to vector<286x3xf32>
    %51 = arith.truncf %50 : vector<286x3xf32> to vector<286x3xbf16>
    %c6 = arith.constant 6 : index
    %c0_35 = arith.constant 0 : index
    %c0_36 = arith.constant 0 : index
    %52 = vector.load %arg2[%c6, %c0_35, %c0_36] : memref<9x3x16xf32, #tpu.memory_space<vmem>>, vector<1x3x16xf32>
    %53 = vector.shape_cast %52 : vector<1x3x16xf32> to vector<3x16xf32>
    %54 = arith.truncf %53 : vector<3x16xf32> to vector<3x16xbf16>
    %cst_37 = arith.constant dense<0.000000e+00> : vector<286x16xf32>
    %55 = tpu.matmul %51, %54, %cst_37 {dimension_numbers = #tpu.dot_dimension_numbers<[1], [0], [0], [1], [0, 0, 1, 1], [], []>} : vector<286x3xbf16>, vector<3x16xbf16>, vector<286x16xf32> -> vector<286x16xf32>
    %56 = arith.addf %48, %55 : vector<286x16xf32>
    %c0_38 = arith.constant 0 : index
    %c37 = arith.constant 37 : index
    %c0_39 = arith.constant 0 : index
    %57 = vector.load %arg1[%c0_38, %c37, %c0_39] : memref<1x324x3xf32, #tpu.memory_space<vmem>>, vector<1x286x3xf32>
    %58 = vector.shape_cast %57 : vector<1x286x3xf32> to vector<286x3xf32>
    %59 = arith.truncf %58 : vector<286x3xf32> to vector<286x3xbf16>
    %c7 = arith.constant 7 : index
    %c0_40 = arith.constant 0 : index
    %c0_41 = arith.constant 0 : index
    %60 = vector.load %arg2[%c7, %c0_40, %c0_41] : memref<9x3x16xf32, #tpu.memory_space<vmem>>, vector<1x3x16xf32>
    %61 = vector.shape_cast %60 : vector<1x3x16xf32> to vector<3x16xf32>
    %62 = arith.truncf %61 : vector<3x16xf32> to vector<3x16xbf16>
    %cst_42 = arith.constant dense<0.000000e+00> : vector<286x16xf32>
    %63 = tpu.matmul %59, %62, %cst_42 {dimension_numbers = #tpu.dot_dimension_numbers<[1], [0], [0], [1], [0, 0, 1, 1], [], []>} : vector<286x3xbf16>, vector<3x16xbf16>, vector<286x16xf32> -> vector<286x16xf32>
    %64 = arith.addf %56, %63 : vector<286x16xf32>
    %c0_43 = arith.constant 0 : index
    %c38 = arith.constant 38 : index
    %c0_44 = arith.constant 0 : index
    %65 = vector.load %arg1[%c0_43, %c38, %c0_44] : memref<1x324x3xf32, #tpu.memory_space<vmem>>, vector<1x286x3xf32>
    %66 = vector.shape_cast %65 : vector<1x286x3xf32> to vector<286x3xf32>
    %67 = arith.truncf %66 : vector<286x3xf32> to vector<286x3xbf16>
    %c8 = arith.constant 8 : index
    %c0_45 = arith.constant 0 : index
    %c0_46 = arith.constant 0 : index
    %68 = vector.load %arg2[%c8, %c0_45, %c0_46] : memref<9x3x16xf32, #tpu.memory_space<vmem>>, vector<1x3x16xf32>
    %69 = vector.shape_cast %68 : vector<1x3x16xf32> to vector<3x16xf32>
    %70 = arith.truncf %69 : vector<3x16xf32> to vector<3x16xbf16>
    %cst_47 = arith.constant dense<0.000000e+00> : vector<286x16xf32>
    %71 = tpu.matmul %67, %70, %cst_47 {dimension_numbers = #tpu.dot_dimension_numbers<[1], [0], [0], [1], [0, 0, 1, 1], [], []>} : vector<286x3xbf16>, vector<3x16xbf16>, vector<286x16xf32> -> vector<286x16xf32>
    %72 = arith.addf %64, %71 : vector<286x16xf32>
    %c0_48 = arith.constant 0 : index
    %c0_49 = arith.constant 0 : index
    %73 = vector.load %arg3[%c0_48, %c0_49] : memref<1x16xf32, #tpu.memory_space<vmem>>, vector<1x16xf32>
    %74 = vector.broadcast %73 : vector<1x16xf32> to vector<286x16xf32>
    %75 = arith.addf %72, %74 : vector<286x16xf32>
    %cst_50 = arith.constant 5.000000e-01 : f32
    %76 = vector.broadcast %cst_50 : f32 to vector<286x16xf32>
    %77 = arith.mulf %76, %75 : vector<286x16xf32>
    %cst_51 = arith.constant 4.471500e-02 : f32
    %78 = vector.broadcast %cst_51 : f32 to vector<286x16xf32>
    %79 = arith.mulf %78, %75 : vector<286x16xf32>
    %80 = arith.mulf %79, %75 : vector<286x16xf32>
    %81 = arith.mulf %80, %75 : vector<286x16xf32>
    %82 = arith.addf %75, %81 : vector<286x16xf32>
    %cst_52 = arith.constant 0.797884583 : f32
    %83 = vector.broadcast %cst_52 : f32 to vector<286x16xf32>
    %84 = arith.mulf %83, %82 : vector<286x16xf32>
    %85 = math.tanh %84 : vector<286x16xf32>
    %cst_53 = arith.constant 1.000000e+00 : f32
    %86 = vector.broadcast %cst_53 : f32 to vector<286x16xf32>
    %87 = arith.addf %86, %85 : vector<286x16xf32>
    %88 = arith.mulf %77, %87 : vector<286x16xf32>
    %c0_54 = arith.constant 0 : index
    %c0_55 = arith.constant 0 : index
    %c0_56 = arith.constant 0 : index
    %89 = vector.load %arg4[%c0_54, %c0_55, %c0_56] : memref<1x286x16xf32, #tpu.memory_space<vmem>>, vector<1x286x16xf32>
    %90 = vector.shape_cast %89 : vector<1x286x16xf32> to vector<286x16xf32>
    %91 = vector.shape_cast %88 : vector<286x16xf32> to vector<1x286x16xf32>
    tpu.vector_store %arg4[%c0_54, %c0_55, %c0_56], %91 {strides = array<i32>} : memref<1x286x16xf32, #tpu.memory_space<vmem>>, vector<1x286x16xf32>,
    return
  }
  func.func @transform_0(%arg0: i32) -> (i32, i32, i32) {
    %c0_i32 = arith.constant 0 : i32
    %c0_i32_0 = arith.constant 0 : i32
    %c0_i32_1 = arith.constant 0 : i32
    return %arg0, %c0_i32, %c0_i32_0 : i32, i32, i32
  }
  func.func @transform_1(%arg0: i32) -> (i32, i32, i32) {
    %c0_i32 = arith.constant 0 : i32
    %c0_i32_0 = arith.constant 0 : i32
    %c0_i32_1 = arith.constant 0 : i32
    %c0_i32_2 = arith.constant 0 : i32
    return %c0_i32, %c0_i32_0, %c0_i32_1 : i32, i32, i32
  }
  func.func @transform_2(%arg0: i32) -> (i32, i32) {
    %c0_i32 = arith.constant 0 : i32
    %c0_i32_0 = arith.constant 0 : i32
    %c0_i32_1 = arith.constant 0 : i32
    return %c0_i32, %c0_i32_0 : i32, i32
  }
  func.func @transform_3(%arg0: i32) -> (i32, i32, i32) {
    %c0_i32 = arith.constant 0 : i32
    %c0_i32_0 = arith.constant 0 : i32
    %c0_i32_1 = arith.constant 0 : i32
    return %arg0, %c0_i32, %c0_i32_0 : i32, i32, i32
  }
}

</mosaic_0001>

<bundles_post_ra>
// kernel: tpu_custom_call.1
= control target key start
LH: loop header
LB: loop body
LE: loop exit
PB: predicated region body
PF: predicated region fallthrough
CT: control target
= control target key end

     0   :  { %s4602_s12 = smov 0   ;;  %s5704_s0 = inlined_call_operand.vmem [shape: f32[2,324,3], index: 0, kind: input, shape index: {}]   ;;  %s5705_s1 = inlined_call_operand.vmem [shape: f32[9,3,16], index: 1, kind: input, shape index: {}]   ;;  %s5706_s2 = inlined_call_operand.vmem [shape: f32[1,16], index: 2, kind: input, shape index: {}]   ;;  %s5707_s3 = inlined_call_operand.vmem [shape: f32[2,286,16], index: 3, kind: output, shape index: {}]  }
   0x1 LB: > { %s3507_s13 = sadd.s32 4294967295, %s4579_s12   ;;  %p3511_p0 = scmp.ge.s32.totalorder %s4579_s12, 1  ;;  %s4579_s12 = sphi %s4602_s12, %s13_s12  }
   0x2   : > { %p137_p1 = scmp.lt.s32.totalorder %s4579_s12, 3 }
   0x4   : > { %p138_p2 = pnand %p3511_p0, %p137_p1 }
   0x5   : > { %vm340_vm0 = vcmask (!%p138_p2), 1040384   ;;  %vm341_vm1 = vcmask (!%p138_p2), 1041408   ;;  %v3589_v0 = vld [vmem:[%s5705_s1 + $0x10] sm:$0x7] (!%p138_p2)  ;;  %p161_p3 = scmp.lt.s32.totalorder (!%p138_p2), %s3507_s13, 1  ;;  %v4581_v1 = vmov (!%p138_p2), 65535  }
   0x6   : > { %141 = sbr.rel (%p138_p2) target bundleno = 611 (0x263), region = 32  ;;  %v342_v2 = vsel (!%p138_p2), %vm340_vm0, 4294967295, %v4581_v1  ;;  %v1468_v3 = vpack.c.bf16 (!%p138_p2), %v3589_v0, %v3589_v0  ;;  %v3514_v4 = vld [vmem:[%s5705_s1 + $0x4] sm:$0x7] (!%p138_p2)  ;;  %v3608_v5 = vld [vmem:[%s5705_s1 + $0x14] sm:$0x7] (!%p138_p2) }
   0x7   : > { %v4619_v6 = vsel (!%p138_p2), %vm341_vm1, %v342_v2, 0  ;;  %v284_v7 = vpack.c.bf16 (!%p138_p2), %v3514_v4, %v3514_v4  ;;  %v1795_v8 = vpack.c.bf16 (!%p138_p2), %v3608_v5, %v3608_v5  ;;  %v226_v9 = vld [vmem:[%s5705_s1] sm:$0x7] (!%p138_p2)  ;;  %v3627_v12 = vld [vmem:[%s5705_s1 + $0x18] sm:$0x7] (!%p138_p2)  ;;  %vm285_vm2 = vcmask (!%p138_p2), 23552  }
   0x8   : > { %v4627_v10 = vand.u32 (!%p138_p2), %v1468_v3, %v4619_v6  ;;  %v227_v11 = vpack.c.bf16 (!%p138_p2), %v226_v9, %v226_v9  ;;  %v3551_v15 = vld [vmem:[%s5705_s1 + $0x8] sm:$0x7] (!%p138_p2)  ;;  %v2122_v17 = vpack.c.bf16 (!%p138_p2), %v3627_v12, %v3627_v12  ;;  %vm3414_vm3 = vcmask (!%p138_p2), 130048  }
   0x9   : > { %v345_v13 = vand.u32 (!%p138_p2), %v4619_v6, %v284_v7  ;;  %v1851_v14 = vand.u32 (!%p138_p2), %v1795_v8, %v4619_v6  ;;  %v814_v21 = vpack.c.bf16 (!%p138_p2), %v3551_v15, %v3551_v15  ;;  %vm3450_vm4 = vcmask (!%p138_p2), 128000  }
   0xa   : > { %4010 = vmatprep.subr.bf16.mxu0 (!%p138_p2), %v4627_v10  ;;  %v579_v16 = vand.u32 (!%p138_p2), %v4619_v6, %v227_v11  ;;  %v4660_v35 = vand.u32 (!%p138_p2), %v2122_v17, %v4619_v6 }
   0xb   : > { %3858 = vmatprep.subr.bf16.mxu1 (!%p138_p2), %v345_v13  ;;  %4011 = vmatpush3.bf16.msra.mxu0 (!%p138_p2), %v4627_v10  ;;  %v4665_v38 = vand.u32 (!%p138_p2), %v814_v21, %v4619_v6 }
   0xc   : > { %3859 = vmatpush3.bf16.msra.mxu1 (!%p138_p2), %v345_v13  ;;  %4048 = vmatprep.subr.bf16.mxu0 (!%p138_p2), %v1851_v14 }
   0xd   : > { %s5709_s13 = smov (!%p161_p3, %s3507_s13), 1  ;;  %3896 = vmatprep.subr.bf16.mxu1 %v579_v16 }
   0xe   : > { %s4490_s24 = smul.u32 328, %s5709_s13 }
   0xf   : > { %s4491_s11 = smul.u32 288, %s5709_s13 }
  0x10   : > { %s4644_s29 = scalar_lea.vmem %s5704_s0, %s4490_s24 }
  0x11   : > { %v228_v18 = vld [vmem:[%s4644_s29 + $0x1] sm:$0xff]  ;;  %v229_v19 = vld [vmem:[%s4644_s29 + $0x9] sm:$0xff]  ;;  %v1412_v20 = vld [vmem:[%s4644_s29 + $0x13] sm:$0xff]  ;;  %s5330_s15 = scalar_lea.vmem %s5707_s3, %s4491_s11 }
  0x12   : > { %v264_v22 = vpack.c.bf16 %v229_v19, %v228_v18  ;;  %v1413_v23 = vld [vmem:[%s4644_s29 + $0x1b] sm:$0xff]  ;;  %v230_v24 = vld [vmem:[%s4644_s29 + $0x11] sm:$0xff]  ;;  %v1414_v28 = vld [vmem:[%s4644_s29 + $0x23] sm:$0xff] }
  0x13   : > { %v231_v25 = vld [vmem:[%s4644_s29 + $0x19] sm:$0xff]  ;;  %v1448_v26 = vpack.c.bf16 %v1413_v23, %v1412_v20  ;;  %v1415_v29 = vld [vmem:[%s4644_s29 + $0x2b] sm:$0xff]  ;;  %v232_v30 = vld [vmem:[%s4644_s29 + $0x21] sm:$0xff] }
  0x14   : > { %v265_v27 = vpack.c.bf16 %v231_v25, %v230_v24  ;;  %3860 = vmatprep.mubr.msk.bf16.mxu1 %vm285_vm2, %v264_v22  ;;  %v1449_v31 = vpack.c.bf16 %v1415_v29, %v1414_v28  ;;  %v233_v32 = vld [vmem:[%s4644_s29 + $0x29] sm:$0xff]  ;;  %v1416_v33 = vld [vmem:[%s4644_s29 + $0x33] sm:$0xff]  ;;  %v1417_v34 = vld [vmem:[%s4644_s29 + $0x3b] sm:$0xff] }
  0x15   : > { %4012 = vmatprep.mubr.msk.bf16.mxu0 %vm285_vm2, %v1448_v26  ;;  %v266_v36 = vpack.c.bf16 %v233_v32, %v232_v30  ;;  %v1450_v37 = vpack.c.bf16 %v1417_v34, %v1416_v33  ;;  %v234_v39 = vld [vmem:[%s4644_s29 + $0x31] sm:$0xff]  ;;  %v235_v40 = vld [vmem:[%s4644_s29 + $0x39] sm:$0xff]  ;;  %v1418_v41 = vld [vmem:[%s4644_s29 + $0x43] sm:$0xff] }
  0x16   : > { %3861 = vmatmul.mubr.msk.bf16.vlgmr.msra.gmra.mrb[0].mxu1 %vm285_vm2, %v265_v27  ;;  %4013 = vmatmul.mubr.msk.bf16.vlgmr.msra.gmra.mrb[0].mxu0 %vm285_vm2, %v1449_v31  ;;  %v1419_v42 = vld [vmem:[%s4644_s29 + $0x4b] sm:$0xff]  ;;  %v236_v43 = vld [vmem:[%s4644_s29 + $0x41] sm:$0xff]  ;;  %v1420_v45 = vld [vmem:[%s4644_s29 + $0x53] sm:$0xff]  ;;  %v267_v47 = vpack.c.bf16 %v235_v40, %v234_v39 }
  0x17   : > { %3897 = vmatpush3.bf16.msra.mxu1 %v579_v16  ;;  %4049 = vmatpush3.bf16.msra.mxu0 %v1851_v14  ;;  %v237_v44 = vld [vmem:[%s4644_s29 + $0x49] sm:$0xff]  ;;  %v1421_v46 = vld [vmem:[%s4644_s29 + $0x5b] sm:$0xff]  ;;  %v1451_v48 = vpack.c.bf16 %v1419_v42, %v1418_v41  ;;  %v238_v51 = vld [vmem:[%s4644_s29 + $0x51] sm:$0xff] }
  0x18   : > { %3864 = vmatprep.mubr.msk.bf16.mxu1 %vm285_vm2, %v266_v36  ;;  %4016 = vmatprep.mubr.msk.bf16.mxu0 %vm285_vm2, %v1450_v37  ;;  %v268_v49 = vpack.c.bf16 %v237_v44, %v236_v43  ;;  %v1452_v50 = vpack.c.bf16 %v1421_v46, %v1420_v45  ;;  %v239_v52 = vld [vmem:[%s4644_s29 + $0x59] sm:$0xff]  ;;  %v1422_v53 = vld [vmem:[%s4644_s29 + $0x63] sm:$0xff]  ;;  %v1423_v54 = vld [vmem:[%s4644_s29 + $0x6b] sm:$0xff] }
  0x19   : > { %4086 = vmatprep.subr.bf16.mxu0 %v4660_v35  ;;  %3934 = vmatprep.subr.bf16.mxu1 %v4665_v38  ;;  %v240_v55 = vld [vmem:[%s4644_s29 + $0x61] sm:$0xff]  ;;  %v241_v56 = vld [vmem:[%s4644_s29 + $0x69] sm:$0xff]  ;;  %v1424_v57 = vld [vmem:[%s4644_s29 + $0x73] sm:$0xff]  ;;  %v269_v59 = vpack.c.bf16 %v239_v52, %v238_v51  ;;  %v1453_v60 = vpack.c.bf16 %v1423_v54, %v1422_v53 }
  0x1a   : > { %v1425_v58 = vld [vmem:[%s4644_s29 + $0x7b] sm:$0xff]  ;;  %v270_v61 = vpack.c.bf16 %v241_v56, %v240_v55  ;;  %v242_v63 = vld [vmem:[%s4644_s29 + $0x71] sm:$0xff]  ;;  %v1426_v1 = vld [vmem:[%s4644_s29 + $0x83] sm:$0xff] }
  0x1b   : > { %v1454_v62 = vpack.c.bf16 %v1425_v58, %v1424_v57  ;;  %v243_v0 = vld [vmem:[%s4644_s29 + $0x79] sm:$0xff]  ;;  %v1427_v2 = vld [vmem:[%s4644_s29 + $0x8b] sm:$0xff]  ;;  %v244_v3 = vld [vmem:[%s4644_s29 + $0x81] sm:$0xff] }
  0x1c   : > { %v245_v4 = vld [vmem:[%s4644_s29 + $0x89] sm:$0xff]  ;;  %v1428_v5 = vld [vmem:[%s4644_s29 + $0x93] sm:$0xff]  ;;  %v1429_v7 = vld [vmem:[%s4644_s29 + $0x9b] sm:$0xff]  ;;  %v271_v8 = vpack.c.bf16 %v243_v0, %v242_v63  ;;  %v1455_v9 = vpack.c.bf16 %v1427_v2, %v1426_v1 }
  0x1d   : > { %v272_v11 = vpack.c.bf16 %v245_v4, %v244_v3  ;;  %v1456_v12 = vpack.c.bf16 %v1429_v7, %v1428_v5  ;;  %v246_v13 = vld [vmem:[%s4644_s29 + $0x91] sm:$0xff]  ;;  %v247_v14 = vld [vmem:[%s4644_s29 + $0x99] sm:$0xff]  ;;  %v1430_v15 = vld [vmem:[%s4644_s29 + $0xa3] sm:$0xff] }
  0x1e   : > { %3865 = vmatmul.mubr.msk.bf16.gmra.mrb[4].mxu1 %vm285_vm2, %v267_v47  ;;  %4017 = vmatmul.mubr.msk.bf16.gmra.mrb[4].mxu0 %vm285_vm2, %v1451_v48  ;;  %v1431_v16 = vld [vmem:[%s4644_s29 + $0xab] sm:$0xff]  ;;  %v248_v17 = vld [vmem:[%s4644_s29 + $0xa1] sm:$0xff]  ;;  %v1739_v19 = vld [vmem:[%s4644_s29 + $0x14] sm:$0xff]  ;;  %v273_v21 = vpack.c.bf16 %v247_v14, %v246_v13 }
  0x1f   : > { %3868 = vmatprep.mubr.msk.bf16.mxu1 %vm285_vm2, %v268_v49  ;;  %4020 = vmatprep.mubr.msk.bf16.mxu0 %vm285_vm2, %v1452_v50  ;;  %v249_v18 = vld [vmem:[%s4644_s29 + $0xa9] sm:$0xff]  ;;  %v1740_v20 = vld [vmem:[%s4644_s29 + $0x1c] sm:$0xff]  ;;  %v1457_v22 = vpack.c.bf16 %v1431_v16, %v1430_v15  ;;  %v250_v26 = vld [vmem:[%s4644_s29 + $0xb1] sm:$0xff] }
  0x20   : > { %v274_v23 = vpack.c.bf16 %v249_v18, %v248_v17  ;;  %v1775_v24 = vpack.c.bf16 %v1740_v20, %v1739_v19  ;;  %v3646_v25 = vld [vmem:[%s5705_s1 + $0x1c] sm:$0x7]  ;;  %v1741_v28 = vld [vmem:[%s4644_s29 + $0x24] sm:$0xff]  ;;  %v1742_v29 = vld [vmem:[%s4644_s29 + $0x2c] sm:$0xff] }
  0x21   : > { %v251_v27 = vld [vmem:[%s4644_s29 + $0xb9] sm:$0xff]  ;;  %v252_v30 = vld [vmem:[%s4644_s29 + $0xc1] sm:$0xff]  ;;  %v253_v31 = vld [vmem:[%s4644_s29 + $0xc9] sm:$0xff]  ;;  %v2449_v34 = vpack.c.bf16 %v3646_v25, %v3646_v25  ;;  %v4731_v37 = vpack.c.bf16 %v1742_v29, %v1741_v28 }
  0x22   : > { %v1743_v32 = vld [vmem:[%s4644_s29 + $0x34] sm:$0xff]  ;;  %v1744_v33 = vld [vmem:[%s4644_s29 + $0x3c] sm:$0xff]  ;;  %v275_v36 = vpack.c.bf16 %v251_v27, %v250_v26  ;;  %v276_v39 = vpack.c.bf16 %v253_v31, %v252_v30  ;;  %v1745_v44 = vld [vmem:[%s4644_s29 + $0x44] sm:$0xff] }
  0x23   : > { %v4733_v40 = vpack.c.bf16 %v1744_v33, %v1743_v32  ;;  %v4736_v41 = vand.u32 %v2449_v34, %v4619_v6  ;;  %v254_v42 = vld [vmem:[%s4644_s29 + $0xd1] sm:$0xff]  ;;  %v255_v43 = vld [vmem:[%s4644_s29 + $0xd9] sm:$0xff]  ;;  %v256_v46 = vld [vmem:[%s4644_s29 + $0xe1] sm:$0xff] }
  0x24   : > { %v1746_v45 = vld [vmem:[%s4644_s29 + $0x4c] sm:$0xff]  ;;  %v1747_v48 = vld [vmem:[%s4644_s29 + $0x54] sm:$0xff]  ;;  %v1748_v49 = vld [vmem:[%s4644_s29 + $0x5c] sm:$0xff]  ;;  %v277_v50 = vpack.c.bf16 %v255_v43, %v254_v42 }
  0x25   : > { %v257_v47 = vld [vmem:[%s4644_s29 + $0xe9] sm:$0xff]  ;;  %v4754_v51 = vpack.c.bf16 %v1746_v45, %v1745_v44  ;;  %v4756_v52 = vpack.c.bf16 %v1748_v49, %v1747_v48  ;;  %v258_v53 = vld [vmem:[%s4644_s29 + $0xf1] sm:$0xff]  ;;  %v259_v54 = vld [vmem:[%s4644_s29 + $0xf9] sm:$0xff] }
  0x26   : > { %3869 = vmatmul.mubr.msk.bf16.gmra.mrb[8].mxu1 %vm285_vm2, %v269_v59  ;;  %4021 = vmatmul.mubr.msk.bf16.gmra.mrb[8].mxu0 %vm285_vm2, %v1453_v60  ;;  %v1749_v55 = vld [vmem:[%s4644_s29 + $0x64] sm:$0xff]  ;;  %v1750_v56 = vld [vmem:[%s4644_s29 + $0x6c] sm:$0xff]  ;;  %v1751_v59 = vld [vmem:[%s4644_s29 + $0x74] sm:$0xff] }
  0x27   : > { %3872 = vmatprep.mubr.msk.bf16.mxu1 %vm285_vm2, %v270_v61  ;;  %4024 = vmatprep.mubr.msk.bf16.mxu0 %vm285_vm2, %v1454_v62  ;;  %v260_v57 = vld [vmem:[%s4644_s29 + $0x101] sm:$0xff]  ;;  %v261_v58 = vld [vmem:[%s4644_s29 + $0x109] sm:$0xff]  ;;  %v279_v61 = vpack.c.bf16 %v259_v54, %v258_v53  ;;  %v4772_v62 = vpack.c.bf16 %v1750_v56, %v1749_v55  ;;  %v262_v1 = vld [vmem:[%s4644_s29 + $0x111] sm:$0xff] }
  0x28   : > { %v1752_v60 = vld [vmem:[%s4644_s29 + $0x7c] sm:$0xff]  ;;  %v280_v63 = vpack.c.bf16 %v261_v58, %v260_v57  ;;  %v1753_v3 = vld [vmem:[%s4644_s29 + $0x84] sm:$0xff]  ;;  %v1754_v4 = vld [vmem:[%s4644_s29 + $0x8c] sm:$0xff] }
  0x29   : > { %v4774_v0 = vpack.c.bf16 %v1752_v60, %v1751_v59  ;;  %v263_v2 = vld [vmem:[%s4644_s29 + $0x119] sm:$0x3f]  ;;  %v172_v5 = vld [vmem:[%s4644_s29] sm:$0xff]  ;;  %v173_v7 = vld [vmem:[%s4644_s29 + $0x8] sm:$0xff] }
  0x2a   : > { %v208_v13 = vpack.c.bf16 %v173_v7, %v172_v5  ;;  %v3570_v15 = vld [vmem:[%s5705_s1 + $0xc] sm:$0x7]  ;;  %v174_v16 = vld [vmem:[%s4644_s29 + $0x10] sm:$0xff]  ;;  %v175_v17 = vld [vmem:[%s4644_s29 + $0x18] sm:$0xff] }
  0x2b   : > { %v1757_v18 = vld [vmem:[%s4644_s29 + $0xa4] sm:$0xff]  ;;  %v1758_v19 = vld [vmem:[%s4644_s29 + $0xac] sm:$0xff]  ;;  %v209_v25 = vpack.c.bf16 %v175_v17, %v174_v16  ;;  %v179_v31 = vld [vmem:[%s4644_s29 + $0x38] sm:$0xff] }
  0x2c   : > { %v176_v20 = vld [vmem:[%s4644_s29 + $0x20] sm:$0xff]  ;;  %v4811_v26 = vpack.c.bf16 %v1758_v19, %v1757_v18  ;;  %v178_v30 = vld [vmem:[%s4644_s29 + $0x30] sm:$0xff]  ;;  %v187_v60 = vld [vmem:[%s4644_s29 + $0x78] sm:$0xff] }
  0x2d   : > { %v1761_v32 = vld [vmem:[%s4644_s29 + $0xc4] sm:$0xff]  ;;  %v1762_v33 = vld [vmem:[%s4644_s29 + $0xcc] sm:$0xff]  ;;  %v1764_v42 = vld [vmem:[%s4644_s29 + $0xdc] sm:$0xff]  ;;  %v211_v43 = vpack.c.bf16 %v179_v31, %v178_v30 }
  0x2e   : > { %3873 = vmatmul.mubr.msk.bf16.gmra.mrb[12].mxu1 %vm285_vm2, %v271_v8  ;;  %4025 = vmatmul.mubr.msk.bf16.gmra.mrb[12].mxu0 %vm285_vm2, %v1455_v9  ;;  %v1755_v8 = vld [vmem:[%s4644_s29 + $0x94] sm:$0xff]  ;;  %v1756_v9 = vld [vmem:[%s4644_s29 + $0x9c] sm:$0xff]  ;;  %v4834_v44 = vpack.c.bf16 %v1762_v33, %v1761_v32  ;;  %v1765_v48 = vld [vmem:[%s4644_s29 + $0xe4] sm:$0xff] }
  0x2f   : > { %3876 = vmatprep.mubr.msk.bf16.mxu1 %vm285_vm2, %v272_v11  ;;  %4028 = vmatprep.mubr.msk.bf16.mxu0 %vm285_vm2, %v1456_v12  ;;  %v281_v11 = vpack.c.bf16 %v263_v2, %v262_v1  ;;  %v4790_v12 = vpack.c.bf16 %v1754_v4, %v1753_v3  ;;  %v4792_v14 = vpack.c.bf16 %v1756_v9, %v1755_v8  ;;  %v180_v34 = vld [vmem:[%s4644_s29 + $0x40] sm:$0xff]  ;;  %v1766_v49 = vld [vmem:[%s4644_s29 + $0xec] sm:$0xff]  ;;  %v1767_v53 = vld [vmem:[%s4644_s29 + $0xf4] sm:$0xff] }
  0x30   : > { %v1768_v54 = vld [vmem:[%s4644_s29 + $0xfc] sm:$0xff]  ;;  %v4852_v56 = vpack.c.bf16 %v1766_v49, %v1765_v48  ;;  %v186_v59 = vld [vmem:[%s4644_s29 + $0x70] sm:$0xff]  ;;  %v189_v2 = vld [vmem:[%s4644_s29 + $0x88] sm:$0xff] }
  0x31   : > { %v4854_v58 = vpack.c.bf16 %v1768_v54, %v1767_v53  ;;  %v188_v1 = vld [vmem:[%s4644_s29 + $0x80] sm:$0xff]  ;;  %v1771_v3 = vld [vmem:[%s4644_s29 + $0x114] sm:$0xff]  ;;  %v215_v5 = vpack.c.bf16 %v187_v60, %v186_v59  ;;  %v1774_v16 = vld [vmem:[%s4644_s29 + $0x12c] sm:$0x3f] }
  0x32   : > { %v1772_v4 = vld [vmem:[%s4644_s29 + $0x11c] sm:$0xff]  ;;  %v216_v8 = vpack.c.bf16 %v189_v2, %v188_v1  ;;  %v193_v18 = vld [vmem:[%s4644_s29 + $0xa8] sm:$0xff] }
  0x33   : > { %v4872_v9 = vpack.c.bf16 %v1772_v4, %v1771_v3  ;;  %v192_v17 = vld [vmem:[%s4644_s29 + $0xa0] sm:$0xff]  ;;  %v759_v48 = vld [vmem:[%s4644_s29 + $0xa] sm:$0xff] }
  0x34   : > { %v763_v53 = vld [vmem:[%s4644_s29 + $0x2a] sm:$0xff]  ;;  %v774_v3 = vld [vmem:[%s4644_s29 + $0x82] sm:$0xff] }
  0x35   : > { %v767_v59 = vld [vmem:[%s4644_s29 + $0x4a] sm:$0xff] }
  0x36   : > { %3877 = vmatmul.mubr.msk.bf16.gmra.mrb[16].mxu1 %vm285_vm2, %v273_v21  ;;  %4029 = vmatmul.mubr.msk.bf16.gmra.mrb[16].mxu0 %vm285_vm2, %v1457_v22  ;;  %v177_v21 = vld [vmem:[%s4644_s29 + $0x28] sm:$0xff]  ;;  %v1759_v22 = vld [vmem:[%s4644_s29 + $0xb4] sm:$0xff] }
  0x37   : > { %3880 = vmatprep.mubr.msk.bf16.mxu1 %vm285_vm2, %v274_v23  ;;  %4050 = vmatprep.mubr.msk.bf16.mxu0 %vm285_vm2, %v1775_v24  ;;  %v1760_v23 = vld [vmem:[%s4644_s29 + $0xbc] sm:$0xff]  ;;  %v1141_v24 = vpack.c.bf16 %v3570_v15, %v3570_v15  ;;  %v210_v27 = vpack.c.bf16 %v177_v21, %v176_v20  ;;  %v4881_v15 = vld [vmem:[%s4644_s29 + $0x124] sm:$0xff]  ;;  %v218_v21 = vpack.c.bf16 %v193_v18, %v192_v17 }
  0x38   : > { %v4813_v28 = vpack.c.bf16 %v1760_v23, %v1759_v22  ;;  %v1792_v20 = vpack.c.bf16 %v1774_v16, %v4881_v15  ;;  %v3665_v22 = vld [vmem:[%s5705_s1 + $0x20] sm:$0x7]  ;;  %v194_v23 = vld [vmem:[%s4644_s29 + $0xb0] sm:$0xff] }
  0x39   : > { %v4816_v29 = vand.u32 %v1141_v24, %v4619_v6  ;;  %v195_v24 = vld [vmem:[%s4644_s29 + $0xb8] sm:$0xff]  ;;  %v2776_v30 = vpack.c.bf16 %v3665_v22, %v3665_v22  ;;  %v775_v4 = vld [vmem:[%s4644_s29 + $0x8a] sm:$0xff] }
  0x3a   : > { %v219_v31 = vpack.c.bf16 %v195_v24, %v194_v23  ;;  %v2100_v16 = vld [vmem:[%s4644_s29 + $0x134] sm:$0xff]  ;;  %v2101_v17 = vld [vmem:[%s4644_s29 + $0x13c] sm:$0x3f]  ;;  %v779_v18 = vld [vmem:[%s4644_s29 + $0xaa] sm:$0xff] }
  0x3b   : > { %v4902_v33 = vand.u32 %v2776_v30, %v4619_v6  ;;  %v200_v6 = vld [vmem:[%s4644_s29 + $0xe0] sm:$0xff]  ;;  %v780_v24 = vld [vmem:[%s4644_s29 + $0xb2] sm:$0xff] }
  0x3c   : > { %v2396_v30 = vld [vmem:[%s4644_s29 + $0x3d] sm:$0xff] }
  0x3e   : > { %3881 = vmatmul.mubr.msk.bf16.gmra.mrb[20].mxu1 %vm285_vm2, %v275_v36  ;;  %4051 = vmatmul.mubr.msk.bf16.vlgmr.msra.gmra.mrb[0].mxu0 %vm285_vm2, %v4731_v37  ;;  %v181_v36 = vld [vmem:[%s4644_s29 + $0x48] sm:$0xff] }
  0x3f   : > { %3884 = vmatprep.mubr.msk.bf16.mxu1 %vm285_vm2, %v276_v39  ;;  %4087 = vmatpush3.bf16.msra.mxu0 %v4660_v35  ;;  %v278_v35 = vpack.c.bf16 %v257_v47, %v256_v46  ;;  %v1763_v39 = vld [vmem:[%s4644_s29 + $0xd4] sm:$0xff]  ;;  %v212_v45 = vpack.c.bf16 %v181_v36, %v180_v34  ;;  %v201_v36 = vld [vmem:[%s4644_s29 + $0xe8] sm:$0xff] }
  0x40   : > { %4054 = vmatprep.mubr.msk.bf16.mxu0 %vm285_vm2, %v4733_v40  ;;  %4124 = vmatprep.subr.bf16.mxu0 %v4736_v41  ;;  %v4836_v46 = vpack.c.bf16 %v1764_v42, %v1763_v39  ;;  %v183_v47 = vld [vmem:[%s4644_s29 + $0x58] sm:$0xff]  ;;  %v198_v34 = vld [vmem:[%s4644_s29 + $0xd0] sm:$0xff]  ;;  %v222_v42 = vpack.c.bf16 %v201_v36, %v200_v6 }
  0x46   : > { %3885 = vmatmul.mubr.msk.bf16.gmra.mrb[24].mxu1 %vm285_vm2, %v277_v50  ;;  %4055 = vmatmul.mubr.msk.bf16.gmra.mrb[4].mxu0 %vm285_vm2, %v4754_v51  ;;  %v184_v50 = vld [vmem:[%s4644_s29 + $0x60] sm:$0xff] }
  0x47   : > { %3888 = vmatprep.mubr.msk.bf16.mxu1 %vm285_vm2, %v278_v35  ;;  %4058 = vmatprep.mubr.msk.bf16.mxu0 %vm285_vm2, %v4756_v52  ;;  %v185_v35 = vld [vmem:[%s4644_s29 + $0x68] sm:$0xff] }
  0x48   : > { %v214_v57 = vpack.c.bf16 %v185_v35, %v184_v50  ;;  %v761_v35 = vld [vmem:[%s4644_s29 + $0x1a] sm:$0xff] }
  0x4e   : > { %3889 = vmatmul.mubr.msk.bf16.gmra.mrb[28].mxu1 %vm285_vm2, %v279_v61  ;;  %4059 = vmatmul.mubr.msk.bf16.gmra.mrb[8].mxu0 %vm285_vm2, %v4772_v62  ;;  %v1769_v61 = vld [vmem:[%s4644_s29 + $0x104] sm:$0xff] }
  0x4f   : > { %3892 = vmatprep.mubr.msk.bf16.mxu1 %vm285_vm2, %v280_v63  ;;  %4062 = vmatprep.mubr.msk.bf16.mxu0 %vm285_vm2, %v4774_v0  ;;  %v1770_v63 = vld [vmem:[%s4644_s29 + $0x10c] sm:$0xff] }
  0x50   : > { %v4870_v7 = vpack.c.bf16 %v1770_v63, %v1769_v61  ;;  %v770_v61 = vld [vmem:[%s4644_s29 + $0x62] sm:$0xff]  ;;  %v771_v63 = vld [vmem:[%s4644_s29 + $0x6a] sm:$0xff] }
  0x51   : > { %v4982_v2 = vpack.c.bf16 %v771_v63, %v770_v61  ;;  %v5082_v63 = vld [vmem:[%s4644_s29 + $0x112] sm:$0xff] }
  0x56   : > { %3893 = vmatmul.mubr.msk.bf16.gmra.mrb[32].mxu1 %vm285_vm2, %v281_v11  ;;  %4063 = vmatmul.mubr.msk.bf16.gmra.mrb[12].mxu0 %vm285_vm2, %v4790_v12  ;;  %v190_v11 = vld [vmem:[%s4644_s29 + $0x90] sm:$0xff] }
  0x57   : > { %3898 = vmatprep.mubr.msk.bf16.mxu1 %vm285_vm2, %v208_v13  ;;  %4066 = vmatprep.mubr.msk.bf16.mxu0 %vm285_vm2, %v4792_v14  ;;  %v191_v13 = vld [vmem:[%s4644_s29 + $0x98] sm:$0xff] }
  0x58   : > { %v217_v19 = vpack.c.bf16 %v191_v13, %v190_v11  ;;  %v777_v13 = vld [vmem:[%s4644_s29 + $0x9a] sm:$0xff] }
  0x5e   : > { %3899 = vmatmul.mubr.msk.bf16.vlgmr.msra.gmra.mrb[0].mxu1 %vm285_vm2, %v209_v25  ;;  %4067 = vmatmul.mubr.msk.bf16.gmra.mrb[16].mxu0 %vm285_vm2, %v4811_v26  ;;  %v196_v25 = vld [vmem:[%s4644_s29 + $0xc0] sm:$0xff] }
  0x5f   : > { %3902 = vmatprep.mubr.msk.bf16.mxu1 %vm285_vm2, %v210_v27  ;;  %4070 = vmatprep.mubr.msk.bf16.mxu0 %vm285_vm2, %v4813_v28  ;;  %v197_v27 = vld [vmem:[%s4644_s29 + $0xc8] sm:$0xff] }
  0x60   : > { %3935 = vmatpush3.bf16.msra.mxu1 %v4665_v38  ;;  %v182_v38 = vld [vmem:[%s4644_s29 + $0x50] sm:$0xff]  ;;  %v220_v32 = vpack.c.bf16 %v197_v27, %v196_v25  ;;  %v781_v25 = vld [vmem:[%s4644_s29 + $0xba] sm:$0xff] }
  0x61   : > { %3972 = vmatprep.subr.bf16.mxu1 %v4816_v29  ;;  %v213_v55 = vpack.c.bf16 %v183_v47, %v182_v38  ;;  %v207_v47 = vld [vmem:[%s4644_s29 + $0x118] sm:$0x3f]  ;;  %v5035_v6 = vpack.c.bf16 %v781_v25, %v780_v24  ;;  %v2418_v24 = vld [vmem:[%s4644_s29 + $0xed] sm:$0xff] }
  0x62   : > { %v2395_v27 = vld [vmem:[%s4644_s29 + $0x35] sm:$0xff] }
  0x63   : > { %v2430_v36 = vpack.c.bf16 %v2396_v30, %v2395_v27  ;;  %v2422_v30 = vld [vmem:[%s4644_s29 + $0x10d] sm:$0xff] }
  0x66   : > { %3903 = vmatmul.mubr.msk.bf16.gmra.mrb[4].mxu1 %vm285_vm2, %v211_v43  ;;  %4071 = vmatmul.mubr.msk.bf16.gmra.mrb[20].mxu0 %vm285_vm2, %v4834_v44  ;;  %v205_v43 = vld [vmem:[%s4644_s29 + $0x108] sm:$0xff] }
  0x67   : > { %3906 = vmatprep.mubr.msk.bf16.mxu1 %vm285_vm2, %v212_v45  ;;  %4074 = vmatprep.mubr.msk.bf16.mxu0 %vm285_vm2, %v4836_v46 }
  0x6e   : > { %3907 = vmatmul.mubr.msk.bf16.gmra.mrb[8].mxu1 %vm285_vm2, %v213_v55  ;;  %4075 = vmatmul.mubr.msk.bf16.gmra.mrb[24].mxu0 %vm285_vm2, %v4852_v56 }
  0x6f   : > { %3910 = vmatprep.mubr.msk.bf16.mxu1 %vm285_vm2, %v214_v57  ;;  %4078 = vmatprep.mubr.msk.bf16.mxu0 %vm285_vm2, %v4854_v58  ;;  %v766_v57 = vld [vmem:[%s4644_s29 + $0x42] sm:$0xff] }
  0x76   : > { %3911 = vmatmul.mubr.msk.bf16.gmra.mrb[12].mxu1 %vm285_vm2, %v215_v5  ;;  %4079 = vmatmul.mubr.msk.bf16.gmra.mrb[28].mxu0 %vm285_vm2, %v4870_v7  ;;  %v2099_v5 = vld [vmem:[%s4644_s29 + $0x12c] sm:$0xff] }
  0x77   : > { %3914 = vmatprep.mubr.msk.bf16.mxu1 %vm285_vm2, %v216_v8  ;;  %4082 = vmatprep.mubr.msk.bf16.mxu0 %vm285_vm2, %v4872_v9  ;;  %v2118_v11 = vpack.c.bf16 %v2099_v5, %v4881_v15  ;;  %v778_v15 = vld [vmem:[%s4644_s29 + $0xa2] sm:$0xff]  ;;  %v2410_v5 = vld [vmem:[%s4644_s29 + $0xad] sm:$0xff] }
  0x78   : > { %v5019_v22 = vpack.c.bf16 %v779_v18, %v778_v15  ;;  %v2413_v15 = vld [vmem:[%s4644_s29 + $0xc5] sm:$0xff]  ;;  %v2414_v18 = vld [vmem:[%s4644_s29 + $0xcd] sm:$0xff] }
  0x7e   : > { %3915 = vmatmul.mubr.msk.bf16.gmra.mrb[16].mxu1 %vm285_vm2, %v217_v19  ;;  %4083 = vmatmul.mubr.msk.bf16.gmra.mrb[32].mxu0 %vm285_vm2, %v1792_v20  ;;  %v2393_v19 = vld [vmem:[%s4644_s29 + $0x25] sm:$0xff] }
  0x7f   : > { %3918 = vmatprep.mubr.msk.bf16.mxu1 %vm285_vm2, %v218_v21  ;;  %4088 = vmatprep.mubr.msk.bf16.mxu0 %vm285_vm2, %v4731_v37  ;;  %v199_v37 = vld [vmem:[%s4644_s29 + $0xd8] sm:$0xff]  ;;  %v2119_v21 = vpack.c.bf16 %v2101_v17, %v2100_v16 }
  0x80   : > { %v221_v39 = vpack.c.bf16 %v199_v37, %v198_v34  ;;  %v2397_v34 = vld [vmem:[%s4644_s29 + $0x45] sm:$0xff]  ;;  %v2398_v37 = vld [vmem:[%s4644_s29 + $0x4d] sm:$0xff]  ;;  %v2411_v16 = vld [vmem:[%s4644_s29 + $0xb5] sm:$0xff] }
  0x81   : > { %v2412_v17 = vld [vmem:[%s4644_s29 + $0xbd] sm:$0xff] }
  0x86   : > { %3919 = vmatmul.mubr.msk.bf16.gmra.mrb[20].mxu1 %vm285_vm2, %v219_v31  ;;  %4089 = vmatmul.mubr.msk.bf16.vlgmr.msra.gmra.mrb[0].mxu0 %vm285_vm2, %v4733_v40  ;;  %v202_v40 = vld [vmem:[%s4644_s29 + $0xf0] sm:$0xff]  ;;  %v782_v31 = vld [vmem:[%s4644_s29 + $0xc2] sm:$0xff] }
  0x87   : > { %3922 = vmatprep.mubr.msk.bf16.mxu1 %vm285_vm2, %v220_v32  ;;  %4125 = vmatpush3.bf16.msra.mxu0 %v4736_v41  ;;  %v203_v41 = vld [vmem:[%s4644_s29 + $0xf8] sm:$0xff]  ;;  %v783_v32 = vld [vmem:[%s4644_s29 + $0xca] sm:$0xff] }
  0x88   : > { %4092 = vmatprep.mubr.msk.bf16.mxu0 %vm285_vm2, %v4754_v51  ;;  %4162 = vmatprep.subr.bf16.mxu0 %v4902_v33  ;;  %v204_v51 = vld [vmem:[%s4644_s29 + $0x100] sm:$0xff]  ;;  %v223_v45 = vpack.c.bf16 %v203_v41, %v202_v40  ;;  %v784_v40 = vld [vmem:[%s4644_s29 + $0xd2] sm:$0xff] }
  0x89   : > { %v224_v38 = vpack.c.bf16 %v205_v43, %v204_v51  ;;  %v785_v41 = vld [vmem:[%s4644_s29 + $0xda] sm:$0xff] }
  0x8a   : > { %v2399_v51 = vld [vmem:[%s4644_s29 + $0x55] sm:$0xff]  ;;  %v2400_v43 = vld [vmem:[%s4644_s29 + $0x5d] sm:$0xff] }
  0x8e   : > { %3923 = vmatmul.mubr.msk.bf16.gmra.mrb[24].mxu1 %vm285_vm2, %v221_v39  ;;  %4093 = vmatmul.mubr.msk.bf16.gmra.mrb[4].mxu0 %vm285_vm2, %v4756_v52  ;;  %v206_v52 = vld [vmem:[%s4644_s29 + $0x110] sm:$0xff]  ;;  %v5037_v39 = vpack.c.bf16 %v783_v32, %v782_v31 }
  0x8f   : > { %3926 = vmatprep.mubr.msk.bf16.mxu1 %vm285_vm2, %v222_v42  ;;  %4096 = vmatprep.mubr.msk.bf16.mxu0 %vm285_vm2, %v4772_v62  ;;  %v758_v62 = vld [vmem:[%s4644_s29 + $0x2] sm:$0xff]  ;;  %v225_v49 = vpack.c.bf16 %v207_v47, %v206_v52  ;;  %v2431_v42 = vpack.c.bf16 %v2398_v37, %v2397_v34  ;;  %v2402_v47 = vld [vmem:[%s4644_s29 + $0x6d] sm:$0xff] }
  0x90   : > { %v794_v50 = vpack.c.bf16 %v759_v48, %v758_v62  ;;  %v2401_v52 = vld [vmem:[%s4644_s29 + $0x65] sm:$0xff]  ;;  %v5054_v62 = vpack.c.bf16 %v785_v41, %v784_v40  ;;  %v2432_v48 = vpack.c.bf16 %v2400_v43, %v2399_v51  ;;  %v2426_v37 = vld [vmem:[%s4644_s29 + $0x12d] sm:$0xff] }
  0x91   : > { %v2425_v34 = vld [vmem:[%s4644_s29 + $0x125] sm:$0xff]  ;;  %v2721_v41 = vld [vmem:[%s4644_s29 + $0x2e] sm:$0xff] }
  0x92   : > { %v2720_v40 = vld [vmem:[%s4644_s29 + $0x26] sm:$0xff] }
  0x93   : > { %v2756_v43 = vpack.c.bf16 %v2721_v41, %v2720_v40  ;;  %v1444_v40 = vld [vmem:[%s4644_s29 + $0x113] sm:$0xff]  ;;  %v1445_v41 = vld [vmem:[%s4644_s29 + $0x11b] sm:$0xff] }
  0x96   : > { %3927 = vmatmul.mubr.msk.bf16.gmra.mrb[28].mxu1 %vm285_vm2, %v223_v45  ;;  %4097 = vmatmul.mubr.msk.bf16.gmra.mrb[8].mxu0 %vm285_vm2, %v4774_v0  ;;  %v760_v0 = vld [vmem:[%s4644_s29 + $0x12] sm:$0xff]  ;;  %v786_v45 = vld [vmem:[%s4644_s29 + $0xe2] sm:$0xff] }
  0x97   : > { %3930 = vmatprep.mubr.msk.bf16.mxu1 %vm285_vm2, %v224_v38  ;;  %4100 = vmatprep.mubr.msk.bf16.mxu0 %vm285_vm2, %v4790_v12  ;;  %v762_v12 = vld [vmem:[%s4644_s29 + $0x22] sm:$0xff]  ;;  %v4946_v54 = vpack.c.bf16 %v761_v35, %v760_v0  ;;  %v787_v38 = vld [vmem:[%s4644_s29 + $0xea] sm:$0xff]  ;;  %v789_v0 = vld [vmem:[%s4644_s29 + $0xfa] sm:$0xff] }
  0x98   : > { %v4948_v55 = vpack.c.bf16 %v763_v53, %v762_v12  ;;  %v2403_v35 = vld [vmem:[%s4644_s29 + $0x75] sm:$0xff]  ;;  %v2404_v12 = vld [vmem:[%s4644_s29 + $0x7d] sm:$0xff] }
  0x99   : > { %v790_v53 = vld [vmem:[%s4644_s29 + $0x102] sm:$0xff] }
  0x9e   : > { %3931 = vmatmul.mubr.msk.bf16.gmra.mrb[32].mxu1 %vm285_vm2, %v225_v49  ;;  %4101 = vmatmul.mubr.msk.bf16.gmra.mrb[12].mxu0 %vm285_vm2, %v4792_v14  ;;  %v764_v14 = vld [vmem:[%s4644_s29 + $0x32] sm:$0xff]  ;;  %v5056_v49 = vpack.c.bf16 %v787_v38, %v786_v45  ;;  %v2724_v45 = vld [vmem:[%s4644_s29 + $0x46] sm:$0xff] }
  0x9f   : > { %3936 = vmatprep.mubr.msk.bf16.mxu1 %vm285_vm2, %v794_v50  ;;  %4104 = vmatprep.mubr.msk.bf16.mxu0 %vm285_vm2, %v4811_v26  ;;  %v765_v26 = vld [vmem:[%s4644_s29 + $0x3a] sm:$0xff]  ;;  %v2433_v50 = vpack.c.bf16 %v2402_v47, %v2401_v52  ;;  %v2725_v38 = vld [vmem:[%s4644_s29 + $0x4e] sm:$0xff] }
  0xa0   : > { %v4964_v60 = vpack.c.bf16 %v765_v26, %v764_v14  ;;  %v791_v14 = vld [vmem:[%s4644_s29 + $0x10a] sm:$0xff]  ;;  %v2758_v47 = vpack.c.bf16 %v2725_v38, %v2724_v45  ;;  %v1464_v45 = vpack.c.bf16 %v1445_v41, %v1444_v40 }
  0xa1   : > { %v2405_v26 = vld [vmem:[%s4644_s29 + $0x85] sm:$0xff] }
  0xa6   : > { %3937 = vmatmul.mubr.msk.bf16.vlgmr.msra.gmra.mrb[0].mxu1 %vm285_vm2, %v4946_v54  ;;  %4105 = vmatmul.mubr.msk.bf16.gmra.mrb[16].mxu0 %vm285_vm2, %v4813_v28  ;;  %v4966_v28 = vpack.c.bf16 %v767_v59, %v766_v57  ;;  %v2406_v57 = vld [vmem:[%s4644_s29 + $0x8d] sm:$0xff] }
  0xa7   : > { %3940 = vmatprep.mubr.msk.bf16.mxu1 %vm285_vm2, %v4948_v55  ;;  %4108 = vmatprep.mubr.msk.bf16.mxu0 %vm285_vm2, %v4834_v44  ;;  %v769_v44 = vld [vmem:[%s4644_s29 + $0x5a] sm:$0xff]  ;;  %v2435_v61 = vpack.c.bf16 %v2406_v57, %v2405_v26  ;;  %v1119_v57 = vld [vmem:[%s4644_s29 + $0x122] sm:$0xff] }
  0xa8   : > { %3973 = vmatpush3.bf16.msra.mxu1 %v4816_v29  ;;  %v768_v29 = vld [vmem:[%s4644_s29 + $0x52] sm:$0xff] }
  0xa9   : > { %4200 = vmatprep.subr.bf16.mxu1 %v4627_v10  ;;  %v4980_v1 = vpack.c.bf16 %v769_v44, %v768_v29  ;;  %v2434_v29 = vpack.c.bf16 %v2404_v12, %v2403_v35  ;;  %v5074_v44 = vpack.c.bf16 %v791_v14, %v790_v53  ;;  %v1118_v35 = vld [vmem:[%s4644_s29 + $0x11a] sm:$0xff]  ;;  %v2732_v12 = vld [vmem:[%s4644_s29 + $0x86] sm:$0xff]  ;;  %v2733_v53 = vld [vmem:[%s4644_s29 + $0x8e] sm:$0xff] }
  0xaa   : > { %v1137_v14 = vpack.c.bf16 %v1118_v35, %v5082_v63  ;;  %v2762_v26 = vpack.c.bf16 %v2733_v53, %v2732_v12  ;;  %v2755_v35 = vld [vmem:[%s4644_s29 + $0x13e] sm:$0x3f] }
  0xae   : > { %3941 = vmatmul.mubr.msk.bf16.gmra.mrb[4].mxu1 %vm285_vm2, %v4964_v60  ;;  %4109 = vmatmul.mubr.msk.bf16.gmra.mrb[20].mxu0 %vm285_vm2, %v4836_v46  ;;  %v772_v46 = vld [vmem:[%s4644_s29 + $0x72] sm:$0xff] }
  0xaf   : > { %3944 = vmatprep.mubr.msk.bf16.mxu1 %vm285_vm2, %v4966_v28  ;;  %4112 = vmatprep.mubr.msk.bf16.mxu0 %vm285_vm2, %v4852_v56  ;;  %v773_v56 = vld [vmem:[%s4644_s29 + $0x7a] sm:$0xff] }
  0xb0   : > { %v4997_v8 = vpack.c.bf16 %v773_v56, %v772_v46  ;;  %v793_v46 = vld [vmem:[%s4644_s29 + $0x11a] sm:$0x3f] }
  0xb1   : > { %v2407_v56 = vld [vmem:[%s4644_s29 + $0x95] sm:$0xff] }
  0xb6   : > { %3945 = vmatmul.mubr.msk.bf16.gmra.mrb[8].mxu1 %vm285_vm2, %v4980_v1  ;;  %4113 = vmatmul.mubr.msk.bf16.gmra.mrb[24].mxu0 %vm285_vm2, %v4854_v58  ;;  %v4999_v58 = vpack.c.bf16 %v775_v4, %v774_v3  ;;  %v2408_v3 = vld [vmem:[%s4644_s29 + $0x9d] sm:$0xff]  ;;  %v2409_v4 = vld [vmem:[%s4644_s29 + $0xa5] sm:$0xff] }
  0xb7   : > { %3948 = vmatprep.mubr.msk.bf16.mxu1 %vm285_vm2, %v4982_v2  ;;  %4116 = vmatprep.mubr.msk.bf16.mxu0 %vm285_vm2, %v4870_v7  ;;  %v776_v7 = vld [vmem:[%s4644_s29 + $0x92] sm:$0xff] }
  0xb8   : > { %v5017_v20 = vpack.c.bf16 %v777_v13, %v776_v7  ;;  %v2436_v7 = vpack.c.bf16 %v2408_v3, %v2407_v56  ;;  %v2437_v13 = vpack.c.bf16 %v2410_v5, %v2409_v4  ;;  %v2736_v56 = vld [vmem:[%s4644_s29 + $0xa6] sm:$0xff] }
  0xbe   : > { %3949 = vmatmul.mubr.msk.bf16.gmra.mrb[12].mxu1 %vm285_vm2, %v4997_v8  ;;  %4117 = vmatmul.mubr.msk.bf16.gmra.mrb[28].mxu0 %vm285_vm2, %v4872_v9  ;;  %v2394_v9 = vld [vmem:[%s4644_s29 + $0x2d] sm:$0xff] }
  0xbf   : > { %3952 = vmatprep.mubr.msk.bf16.mxu1 %vm285_vm2, %v4999_v58  ;;  %4120 = vmatprep.mubr.msk.bf16.mxu0 %vm285_vm2, %v2118_v11  ;;  %v2429_v23 = vpack.c.bf16 %v2394_v9, %v2393_v19  ;;  %v811_v11 = vpack.c.bf16 %v793_v46, %v5082_v63  ;;  %v2438_v19 = vpack.c.bf16 %v2412_v17, %v2411_v16  ;;  %v1432_v46 = vld [vmem:[%s4644_s29 + $0xb3] sm:$0xff]  ;;  %v1433_v63 = vld [vmem:[%s4644_s29 + $0xbb] sm:$0xff] }
  0xc0   : > { %v2439_v9 = vpack.c.bf16 %v2414_v18, %v2413_v15  ;;  %v1458_v5 = vpack.c.bf16 %v1433_v63, %v1432_v46  ;;  %v2738_v16 = vld [vmem:[%s4644_s29 + $0xb6] sm:$0xff]  ;;  %v2739_v17 = vld [vmem:[%s4644_s29 + $0xbe] sm:$0xff] }
  0xc1   : > { %v1436_v15 = vld [vmem:[%s4644_s29 + $0xd3] sm:$0xff]  ;;  %v1437_v18 = vld [vmem:[%s4644_s29 + $0xdb] sm:$0xff] }
  0xc6   : > { %3953 = vmatmul.mubr.msk.bf16.gmra.mrb[16].mxu1 %vm285_vm2, %v5017_v20  ;;  %4121 = vmatmul.mubr.msk.bf16.gmra.mrb[32].mxu0 %vm285_vm2, %v2119_v21  ;;  %v2416_v21 = vld [vmem:[%s4644_s29 + $0xdd] sm:$0xff] }
  0xc7   : > { %3956 = vmatprep.mubr.msk.bf16.mxu1 %vm285_vm2, %v5019_v22  ;;  %4126 = vmatprep.mubr.msk.bf16.mxu0 %vm285_vm2, %v2429_v23  ;;  %v2417_v23 = vld [vmem:[%s4644_s29 + $0xe5] sm:$0xff] }
  0xc8   : > { %v2441_v27 = vpack.c.bf16 %v2418_v24, %v2417_v23  ;;  %v1460_v23 = vpack.c.bf16 %v1437_v18, %v1436_v15  ;;  %v5265_v18 = vld [vmem:[%s5706_s2] ss:$0 sm:$0xff] }
  0xce   : > { %3957 = vmatmul.mubr.msk.bf16.gmra.mrb[20].mxu1 %vm285_vm2, %v5035_v6  ;;  %4127 = vmatmul.mubr.msk.bf16.vlgmr.msra.gmra.mrb[0].mxu0 %vm285_vm2, %v2430_v36 }
  0xcf   : > { %3960 = vmatprep.mubr.msk.bf16.mxu1 %vm285_vm2, %v5037_v39  ;;  %4163 = vmatpush3.bf16.msra.mxu0 %v4902_v33  ;;  %v788_v33 = vld [vmem:[%s4644_s29 + $0xf2] sm:$0xff] }
  0xd0   : > { %4130 = vmatprep.mubr.msk.bf16.mxu0 %vm285_vm2, %v2431_v42  ;;  %v5072_v59 = vpack.c.bf16 %v789_v0, %v788_v33  ;;  %v2445_v42 = vpack.c.bf16 %v2426_v37, %v2425_v34 }
  0xd6   : > { %3961 = vmatmul.mubr.msk.bf16.gmra.mrb[24].mxu1 %vm285_vm2, %v5054_v62  ;;  %4131 = vmatmul.mubr.msk.bf16.gmra.mrb[4].mxu0 %vm285_vm2, %v2432_v48  ;;  %v2728_v48 = vld [vmem:[%s4644_s29 + $0x66] sm:$0xff] }
  0xd7   : > { %3964 = vmatprep.mubr.msk.bf16.mxu1 %vm285_vm2, %v5056_v49  ;;  %4134 = vmatprep.mubr.msk.bf16.mxu0 %vm285_vm2, %v2433_v50  ;;  %v2729_v50 = vld [vmem:[%s4644_s29 + $0x6e] sm:$0xff] }
  0xd8   : > { %v2760_v0 = vpack.c.bf16 %v2729_v50, %v2728_v48  ;;  %v2752_v48 = vld [vmem:[%s4644_s29 + $0x126] sm:$0xff]  ;;  %v2753_v50 = vld [vmem:[%s4644_s29 + $0x12e] sm:$0xff] }
  0xde   : > { %3965 = vmatmul.mubr.msk.bf16.gmra.mrb[28].mxu1 %vm285_vm2, %v5072_v59  ;;  %4135 = vmatmul.mubr.msk.bf16.gmra.mrb[8].mxu0 %vm285_vm2, %v2434_v29  ;;  %v2734_v29 = vld [vmem:[%s4644_s29 + $0x96] sm:$0xff] }
  0xdf   : > { %3968 = vmatprep.mubr.msk.bf16.mxu1 %vm285_vm2, %v5074_v44  ;;  %4138 = vmatprep.mubr.msk.bf16.mxu0 %vm285_vm2, %v2435_v61  ;;  %v2735_v61 = vld [vmem:[%s4644_s29 + $0x9e] sm:$0xff] }
  0xe0   : > { %v2763_v4 = vpack.c.bf16 %v2735_v61, %v2734_v29 }
  0xe6   : > { %3969 = vmatmul.mubr.msk.bf16.gmra.mrb[32].mxu1 %vm285_vm2, %v811_v11  ;;  %4139 = vmatmul.mubr.msk.bf16.gmra.mrb[12].mxu0 %vm285_vm2, %v2436_v7  ;;  %v1434_v7 = vld [vmem:[%s4644_s29 + $0xc3] sm:$0xff] }
  0xe7   : > { %3974 = vmatprep.mubr.msk.bf16.mxu1 %vm285_vm2, %v4946_v54  ;;  %4142 = vmatprep.mubr.msk.bf16.mxu0 %vm285_vm2, %v2437_v13  ;;  %v2415_v54 = vld [vmem:[%s4644_s29 + $0xd5] sm:$0xff]  ;;  %v1435_v13 = vld [vmem:[%s4644_s29 + $0xcb] sm:$0xff] }
  0xe8   : > { %v2440_v25 = vpack.c.bf16 %v2416_v21, %v2415_v54  ;;  %v1459_v54 = vpack.c.bf16 %v1435_v13, %v1434_v7  ;;  %v2765_v21 = vpack.c.bf16 %v2739_v17, %v2738_v16 }
  0xee   : > { %3975 = vmatmul.mubr.msk.bf16.vlgmr.msra.gmra.mrb[0].mxu1 %vm285_vm2, %v4948_v55  ;;  %4143 = vmatmul.mubr.msk.bf16.gmra.mrb[16].mxu0 %vm285_vm2, %v2438_v19  ;;  %v2420_v55 = vld [vmem:[%s4644_s29 + $0xfd] sm:$0xff]  ;;  %v2740_v19 = vld [vmem:[%s4644_s29 + $0xc6] sm:$0xff] }
  0xef   : > { %3978 = vmatprep.mubr.msk.bf16.mxu1 %vm285_vm2, %v4964_v60  ;;  %4146 = vmatprep.mubr.msk.bf16.mxu0 %vm285_vm2, %v2439_v9  ;;  %v2421_v60 = vld [vmem:[%s4644_s29 + $0x105] sm:$0xff]  ;;  %v2741_v9 = vld [vmem:[%s4644_s29 + $0xce] sm:$0xff] }
  0xf0   : > { %4201 = vmatpush3.bf16.msra.mxu1 %v4627_v10  ;;  %v2419_v10 = vld [vmem:[%s4644_s29 + $0xf5] sm:$0xff]  ;;  %v2443_v32 = vpack.c.bf16 %v2422_v30, %v2421_v60  ;;  %v2766_v24 = vpack.c.bf16 %v2741_v9, %v2740_v19 }
  0xf1   : > { %v2442_v31 = vpack.c.bf16 %v2420_v55, %v2419_v10  ;;  %v2742_v10 = vld [vmem:[%s4644_s29 + $0xd6] sm:$0xff]  ;;  %v2743_v55 = vld [vmem:[%s4644_s29 + $0xde] sm:$0xff] }
  0xf2   : > { %v1440_v60 = vld [vmem:[%s4644_s29 + $0xf3] sm:$0xff]  ;;  %v1441_v30 = vld [vmem:[%s4644_s29 + $0xfb] sm:$0xff] }
  0xf3   : > { %v1462_v34 = vpack.c.bf16 %v1441_v30, %v1440_v60 }
  0xf6   : > { %3979 = vmatmul.mubr.msk.bf16.gmra.mrb[4].mxu1 %vm285_vm2, %v4966_v28  ;;  %4147 = vmatmul.mubr.msk.bf16.gmra.mrb[20].mxu0 %vm285_vm2, %v2440_v25  ;;  %v2423_v28 = vld [vmem:[%s4644_s29 + $0x115] sm:$0xff]  ;;  %v1438_v25 = vld [vmem:[%s4644_s29 + $0xe3] sm:$0xff] }
  0xf7   : > { %3982 = vmatprep.mubr.msk.bf16.mxu1 %vm285_vm2, %v4980_v1  ;;  %4150 = vmatprep.mubr.msk.bf16.mxu0 %vm285_vm2, %v2441_v27  ;;  %v2424_v1 = vld [vmem:[%s4644_s29 + $0x11d] sm:$0xff]  ;;  %v1439_v27 = vld [vmem:[%s4644_s29 + $0xeb] sm:$0xff] }
  0xf8   : > { %v2444_v36 = vpack.c.bf16 %v2424_v1, %v2423_v28  ;;  %v1461_v28 = vpack.c.bf16 %v1439_v27, %v1438_v25  ;;  %v2767_v1 = vpack.c.bf16 %v2743_v55, %v2742_v10 }
  0xfe   : > { %3983 = vmatmul.mubr.msk.bf16.gmra.mrb[8].mxu1 %vm285_vm2, %v4982_v2  ;;  %4151 = vmatmul.mubr.msk.bf16.gmra.mrb[24].mxu0 %vm285_vm2, %v2442_v31  ;;  %v2427_v2 = vld [vmem:[%s4644_s29 + $0x135] sm:$0xff]  ;;  %v2744_v31 = vld [vmem:[%s4644_s29 + $0xe6] sm:$0xff] }
  0xff   : > { %3986 = vmatprep.mubr.msk.bf16.mxu1 %vm285_vm2, %v4997_v8  ;;  %4154 = vmatprep.mubr.msk.bf16.mxu0 %vm285_vm2, %v2443_v32  ;;  %v2428_v8 = vld [vmem:[%s4644_s29 + $0x13d] sm:$0x3f]  ;;  %v2745_v32 = vld [vmem:[%s4644_s29 + $0xee] sm:$0xff] }
 0x100   : > { %v2446_v51 = vpack.c.bf16 %v2428_v8, %v2427_v2  ;;  %v2768_v37 = vpack.c.bf16 %v2745_v32, %v2744_v31  ;;  %v2746_v2 = vld [vmem:[%s4644_s29 + $0xf6] sm:$0xff]  ;;  %v2747_v8 = vld [vmem:[%s4644_s29 + $0xfe] sm:$0xff] }
 0x106   : > { %3987 = vmatmul.mubr.msk.bf16.gmra.mrb[12].mxu1 %vm285_vm2, %v4999_v58  ;;  %4155 = vmatmul.mubr.msk.bf16.gmra.mrb[28].mxu0 %vm285_vm2, %v2444_v36  ;;  %v2722_v58 = vld [vmem:[%s4644_s29 + $0x36] sm:$0xff]  ;;  %v1442_v36 = vld [vmem:[%s4644_s29 + $0x103] sm:$0xff] }
 0x107   : > { %3990 = vmatprep.mubr.msk.bf16.mxu1 %vm285_vm2, %v5017_v20  ;;  %4158 = vmatprep.mubr.msk.bf16.mxu0 %vm285_vm2, %v2445_v42  ;;  %v2723_v20 = vld [vmem:[%s4644_s29 + $0x3e] sm:$0xff]  ;;  %v1443_v42 = vld [vmem:[%s4644_s29 + $0x10b] sm:$0xff] }
 0x108   : > { %v2757_v52 = vpack.c.bf16 %v2723_v20, %v2722_v58  ;;  %v1463_v58 = vpack.c.bf16 %v1443_v42, %v1442_v36  ;;  %v2769_v20 = vpack.c.bf16 %v2747_v8, %v2746_v2 }
 0x10e   : > { %3991 = vmatmul.mubr.msk.bf16.gmra.mrb[16].mxu1 %vm285_vm2, %v5019_v22  ;;  %4159 = vmatmul.mubr.msk.bf16.gmra.mrb[32].mxu0 %vm285_vm2, %v2446_v51  ;;  %v2726_v22 = vld [vmem:[%s4644_s29 + $0x56] sm:$0xff]  ;;  %v2748_v51 = vld [vmem:[%s4644_s29 + $0x106] sm:$0xff] }
 0x10f   : > { %3994 = vmatprep.mubr.msk.bf16.mxu1 %vm285_vm2, %v5035_v6  ;;  %4164 = vmatprep.mubr.msk.bf16.mxu0 %vm285_vm2, %v2756_v43  ;;  %v2727_v6 = vld [vmem:[%s4644_s29 + $0x5e] sm:$0xff]  ;;  %v2749_v43 = vld [vmem:[%s4644_s29 + $0x10e] sm:$0xff] }
 0x110   : > { %v2759_v33 = vpack.c.bf16 %v2727_v6, %v2726_v22  ;;  %v2770_v38 = vpack.c.bf16 %v2749_v43, %v2748_v51  ;;  %v2750_v22 = vld [vmem:[%s4644_s29 + $0x116] sm:$0xff]  ;;  %v2751_v6 = vld [vmem:[%s4644_s29 + $0x11e] sm:$0xff] }
 0x116   : > { %3995 = vmatmul.mubr.msk.bf16.gmra.mrb[20].mxu1 %vm285_vm2, %v5037_v39  ;;  %4165 = vmatmul.mubr.msk.bf16.vlgmr.msra.gmra.mrb[0].mxu0 %vm285_vm2, %v2757_v52  ;;  %v2730_v39 = vld [vmem:[%s4644_s29 + $0x76] sm:$0xff]  ;;  %v1446_v52 = vld [vmem:[%s4644_s29 + $0x123] sm:$0xff] }
 0x117   : > { %3998 = vmatprep.mubr.msk.bf16.mxu1 %vm285_vm2, %v5054_v62  ;;  %4168 = vmatprep.mubr.msk.bf16.mxu0 %vm285_vm2, %v2758_v47  ;;  %v2731_v62 = vld [vmem:[%s4644_s29 + $0x7e] sm:$0xff]  ;;  %v1447_v47 = vld [vmem:[%s4644_s29 + $0x12b] sm:$0x3f] }
 0x11e   : > { %3999 = vmatmul.mubr.msk.bf16.gmra.mrb[24].mxu1 %vm285_vm2, %v5056_v49  ;;  %4169 = vmatmul.mubr.msk.bf16.gmra.mrb[4].mxu0 %vm285_vm2, %v2759_v33  ;;  %v2761_v49 = vpack.c.bf16 %v2731_v62, %v2730_v39  ;;  %v1465_v33 = vpack.c.bf16 %v1447_v47, %v1446_v52  ;;  %v2772_v39 = vpack.c.bf16 %v2753_v50, %v2752_v48  ;;  %v2754_v62 = vld [vmem:[%s4644_s29 + $0x136] sm:$0xff] }
 0x11f   : > { %4002 = vmatprep.mubr.msk.bf16.mxu1 %vm285_vm2, %v5072_v59  ;;  %4172 = vmatprep.mubr.msk.bf16.mxu0 %vm285_vm2, %v2760_v0  ;;  %v1120_v59 = vld [vmem:[%s4644_s29 + $0x12a] sm:$0x3f]  ;;  %v2771_v0 = vpack.c.bf16 %v2751_v6, %v2750_v22  ;;  %v2773_v12 = vpack.c.bf16 %v2755_v35, %v2754_v62 }
 0x120   : > { %v1138_v3 = vpack.c.bf16 %v1120_v59, %v1119_v57 }
 0x126   : > { %4003 = vmatmul.mubr.msk.bf16.gmra.mrb[28].mxu1 %vm285_vm2, %v5074_v44  ;;  %4173 = vmatmul.mubr.msk.bf16.gmra.mrb[8].mxu0 %vm285_vm2, %v2761_v49  ;;  %v2737_v44 = vld [vmem:[%s4644_s29 + $0xae] sm:$0xff] }
 0x127   : > { %4006 = vmatprep.mubr.msk.bf16.mxu1 %vm285_vm2, %v1137_v14  ;;  %4176 = vmatprep.mubr.msk.bf16.mxu0 %vm285_vm2, %v2762_v26  ;;  %v2764_v11 = vpack.c.bf16 %v2737_v44, %v2736_v56 }
 0x12e   : > { %4007 = vmatmul.mubr.msk.bf16.gmra.mrb[32].mxu1 %vm285_vm2, %v1138_v3  ;;  %4177 = vmatmul.mubr.msk.bf16.gmra.mrb[12].mxu0 %vm285_vm2, %v2763_v4 }
 0x12f   : > { %4032 = vmatprep.mubr.msk.bf16.mxu1 %vm285_vm2, %v1458_v5  ;;  %4180 = vmatprep.mubr.msk.bf16.mxu0 %vm285_vm2, %v2764_v11 }
 0x136   : > { %4033 = vmatmul.mubr.msk.bf16.vlgmr.msra.gmra.mrb[20].mxu1 %vm285_vm2, %v1459_v54  ;;  %4181 = vmatmul.mubr.msk.bf16.gmra.mrb[16].mxu0 %vm285_vm2, %v2765_v21 }
 0x137   : > { %4036 = vmatprep.mubr.msk.bf16.mxu1 %vm285_vm2, %v1460_v23  ;;  %4184 = vmatprep.mubr.msk.bf16.mxu0 %vm285_vm2, %v2766_v24 }
 0x13e   : > { %4037 = vmatmul.mubr.msk.bf16.gmra.mrb[24].mxu1 %vm285_vm2, %v1461_v28  ;;  %4185 = vmatmul.mubr.msk.bf16.gmra.mrb[20].mxu0 %vm285_vm2, %v2767_v1 }
 0x13f   : > { %4040 = vmatprep.mubr.msk.bf16.mxu1 %vm285_vm2, %v1462_v34  ;;  %4188 = vmatprep.mubr.msk.bf16.mxu0 %vm285_vm2, %v2768_v37 }
 0x146   : > { %4041 = vmatmul.mubr.msk.bf16.gmra.mrb[28].mxu1 %vm285_vm2, %v1463_v58  ;;  %4189 = vmatmul.mubr.msk.bf16.gmra.mrb[24].mxu0 %vm285_vm2, %v2769_v20 }
 0x147   : > { %4044 = vmatprep.mubr.msk.bf16.mxu1 %vm285_vm2, %v1464_v45  ;;  %4192 = vmatprep.mubr.msk.bf16.mxu0 %vm285_vm2, %v2770_v38 }
 0x14e   : > { %4045 = vmatmul.mubr.msk.bf16.gmra.mrb[32].mxu1 %vm285_vm2, %v1465_v33  ;;  %4193 = vmatmul.mubr.msk.bf16.gmra.mrb[28].mxu0 %vm285_vm2, %v2771_v0 }
 0x14f   : > { %4196 = vmatprep.mubr.msk.bf16.mxu0 %vm285_vm2, %v2772_v39 }
 0x156   : > { %4197 = vmatmul.mubr.msk.bf16.gmra.mrb[32].mxu0 %vm285_vm2, %v2773_v12 }
 0x1c1   : > { %v3976_v53 = vpop.f32.mrb[0].mxu1 }
 0x1c2   : > { %v1233_v49 = vpop.f32.mrb[1].mxu1 }
 0x1c3   : > { %v3977_v14 = vpop.f32.mrb[2].mxu1 }
 0x1c4   : > { %v1236_v26 = vpop.f32.mrb[3].mxu1 }
 0x1c9   : > { %v3980_v57 = vpop.f32.mrb[4].mxu1 }
 0x1ca   : > { %v1249_v59 = vpop.f32.mrb[5].mxu1 }
 0x1cb   : > { %v3981_v29 = vpop.f32.mrb[6].mxu1 }
 0x1cc   : > { %v1252_v61 = vpop.f32.mrb[7].mxu1 }
 0x1d1   : > { %v5238_v46 = vpop.f32.mrb[8].mxu1 }
 0x1d2   : > { %v5240_v63 = vpop.f32.mrb[9].mxu1 }
 0x1d3   : > { %v5242_v56 = vpop.f32.mrb[10].mxu1 }
 0x1d4   : > { %v5244_v44 = vpop.f32.mrb[11].mxu1 }
 0x1d9   : > { %v5246_v3 = vpop.f32.mrb[12].mxu1 }
 0x1da   : > { %v5248_v4 = vpop.f32.mrb[13].mxu1 }
 0x1db   : > { %v5250_v5 = vpop.f32.mrb[14].mxu1 }
 0x1dc   : > { %v5252_v11 = vpop.f32.mrb[15].mxu1 }
 0x1e1   : > { %v5254_v7 = vpop.f32.mrb[16].mxu1 }
 0x1e2   : > { %v5256_v13 = vpop.f32.mrb[17].mxu1 }
 0x1e3   : > { %v5258_v16 = vpop.f32.mrb[18].mxu1 }
 0x1e4   : > { %v5260_v17 = vpop.f32.mrb[19].mxu1 }
 0x1e9   : > { %v4166_v15 = vpop.f32.mrb[0].mxu0 }
 0x1ea   : > { %v4202_v19 = vadd.f32 %v4166_v15, %v3976_v53  ;;  %v2868_v9 = vpop.f32.mrb[1].mxu0 }
 0x1eb   : > { %v4203_v54 = vadd.f32 %v2868_v9, %v1233_v49  ;;  %v4167_v21 = vpop.f32.mrb[2].mxu0 }
 0x1ec   : > { %v3056_v23 = vadd.f32 %v4202_v19, %v5265_v18  ;;  %v4204_v24 = vadd.f32 %v4167_v21, %v3977_v14  ;;  %v2871_v25 = vpop.f32.mrb[3].mxu0 }
 0x1ed   : > { %v3054_v27 = vadd.f32 %v4203_v54, %v5265_v18  ;;  %v4205_v10 = vadd.f32 %v2871_v25, %v1236_v26 }
 0x1ee   : > { %v3128_v55 = vmul.f32 0.044715, %v3056_v23  ;;  %v5270_v60 = vadd.f32 %v4204_v24, %v5265_v18 }
 0x1ef   : > { %v3126_v30 = vmul.f32 0.044715, %v3054_v27  ;;  %v5273_v31 = vadd.f32 %v4205_v10, %v5265_v18  ;;  %v3090_v9 = vmul.f32 0.5, %v3054_v27 }
 0x1f0   : > { %v3164_v32 = vmul.f32 %v3128_v55, %v3056_v23  ;;  %v3129_v28 = vmul.f32 0.044715, %v5270_v60 }
 0x1f1   : > { %v3162_v1 = vmul.f32 %v3126_v30, %v3054_v27  ;;  %v3127_v34 = vmul.f32 0.044715, %v5273_v31  ;;  %v4170_v37 = vpop.f32.mrb[4].mxu0 }
 0x1f2   : > { %v3200_v36 = vmul.f32 %v3164_v32, %v3056_v23  ;;  %v3165_v42 = vmul.f32 %v3129_v28, %v5270_v60  ;;  %v4206_v2 = vadd.f32 %v4170_v37, %v3980_v57  ;;  %v2884_v8 = vpop.f32.mrb[5].mxu0 }
 0x1f3   : > { %v3198_v40 = vmul.f32 %v3162_v1, %v3054_v27  ;;  %v3163_v41 = vmul.f32 %v3127_v34, %v5273_v31  ;;  %v4207_v51 = vadd.f32 %v2884_v8, %v1249_v59  ;;  %v4171_v43 = vpop.f32.mrb[6].mxu0 }
 0x1f4   : > { %v3236_v58 = vadd.f32 %v3200_v36, %v3056_v23  ;;  %v3201_v20 = vmul.f32 %v3165_v42, %v5270_v60  ;;  %v3060_v45 = vadd.f32 %v4206_v2, %v5265_v18  ;;  %v4208_v38 = vadd.f32 %v4171_v43, %v3981_v29  ;;  %v2887_v52 = vpop.f32.mrb[7].mxu0 }
 0x1f5   : > { %v3234_v47 = vadd.f32 %v3198_v40, %v3054_v27  ;;  %v3199_v22 = vmul.f32 %v3163_v41, %v5273_v31  ;;  %v3058_v6 = vadd.f32 %v4207_v51, %v5265_v18  ;;  %v4209_v48 = vadd.f32 %v2887_v52, %v1252_v61 }
 0x1f6   : > { %v3272_v50 = vmul.f32 0.7978846, %v3236_v58  ;;  %v3237_v33 = vadd.f32 %v3201_v20, %v5270_v60  ;;  %v3132_v0 = vmul.f32 0.044715, %v3060_v45  ;;  %v5286_v49 = vadd.f32 %v4208_v38, %v5265_v18 }
 0x1f7   : > { %v3270_v39 = vmul.f32 0.7978846, %v3234_v47  ;;  %v3235_v62 = vadd.f32 %v3199_v22, %v5273_v31  ;;  %v3130_v35 = vmul.f32 0.044715, %v3058_v6  ;;  %v5289_v57 = vadd.f32 %v4209_v48, %v5265_v18 }
 0x1f8   : > { %4501 = vtanh.f32 %v3272_v50  ;;  %v3273_v12 = vmul.f32 0.7978846, %v3237_v33  ;;  %v3168_v53 = vmul.f32 %v3132_v0, %v3060_v45  ;;  %v3092_v29 = vmul.f32 0.5, %v3056_v23 }
 0x1f9   : > { %4503 = vtanh.f32 %v3270_v39  ;;  %v3271_v14 = vmul.f32 0.7978846, %v3235_v62  ;;  %v3166_v26 = vmul.f32 %v3130_v35, %v3058_v6  ;;  %v4174_v59 = vpop.f32.mrb[8].mxu0  ;;  %v3133_v15 = vmul.f32 0.044715, %v5286_v49 }
 0x1fa   : > { %4505 = vtanh.f32 %v3273_v12  ;;  %v3204_v61 = vmul.f32 %v3168_v53, %v3060_v45  ;;  %v2900_v19 = vpop.f32.mrb[9].mxu0  ;;  %v3131_v21 = vmul.f32 0.044715, %v5289_v57  ;;  %v4210_v55 = vadd.f32 %v4174_v59, %v5238_v46 }
 0x1fb   : > { %4507 = vtanh.f32 %v3271_v14  ;;  %v3202_v54 = vmul.f32 %v3166_v26, %v3058_v6  ;;  %v4175_v24 = vpop.f32.mrb[10].mxu0  ;;  %v3169_v10 = vmul.f32 %v3133_v15, %v5286_v49  ;;  %v4211_v23 = vadd.f32 %v2900_v19, %v5240_v63 }
 0x1fc   : > { %v3240_v25 = vadd.f32 %v3204_v61, %v3060_v45  ;;  %v2903_v30 = vpop.f32.mrb[11].mxu0  ;;  %v3167_v28 = vmul.f32 %v3131_v21, %v5289_v57  ;;  %v4212_v27 = vadd.f32 %v4175_v24, %v5242_v56  ;;  %v5301_v36 = vadd.f32 %v4210_v55, %v5265_v18 }
 0x1fd   : > { %v3238_v32 = vadd.f32 %v3202_v54, %v3058_v6  ;;  %v4213_v1 = vadd.f32 %v2903_v30, %v5244_v44  ;;  %v3205_v37 = vmul.f32 %v3169_v10, %v5286_v49  ;;  %v5304_v42 = vadd.f32 %v4211_v23, %v5265_v18 }
 0x1fe   : > { %v3276_v34 = vmul.f32 0.7978846, %v3240_v25  ;;  %v3093_v46 = vmul.f32 0.5, %v5270_v60  ;;  %v3203_v2 = vmul.f32 %v3167_v28, %v5289_v57  ;;  %v5309_v8 = vadd.f32 %v4212_v27, %v5265_v18 }
 0x1ff   : > { %v3274_v63 = vmul.f32 0.7978846, %v3238_v32  ;;  %v3091_v56 = vmul.f32 0.5, %v5273_v31  ;;  %v3241_v44 = vadd.f32 %v3205_v37, %v5286_v49  ;;  %v3136_v40 = vmul.f32 0.044715, %v5301_v36 }
 0x200   : > { %4509 = vtanh.f32 %v3276_v34  ;;  %v5315_v41 = vmul.f32 0.5, %v3060_v45  ;;  %v3239_v51 = vadd.f32 %v3203_v2, %v5289_v57  ;;  %v3134_v60 = vmul.f32 0.044715, %v5304_v42 }
 0x201   : > { %4511 = vtanh.f32 %v3274_v63  ;;  %v4178_v43 = vpop.f32.mrb[12].mxu0  ;;  %v5319_v20 = vmul.f32 0.5, %v3058_v6  ;;  %v3277_v38 = vmul.f32 0.7978846, %v3241_v44  ;;  %v3172_v52 = vmul.f32 %v3136_v40, %v5301_v36 }
 0x202   : > { %v4502_v58 = vpop.eup %4501  ;;  %v3137_v31 = vmul.f32 0.044715, %v5309_v8  ;;  %v2916_v47 = vpop.f32.mrb[13].mxu0  ;;  %v3275_v50 = vmul.f32 0.7978846, %v3239_v51  ;;  %v3170_v45 = vmul.f32 %v3134_v60, %v5304_v42  ;;  %v5325_v33 = vadd.f32 %v4213_v1, %v5265_v18 }
 0x203   : > { %v4504_v22 = vpop.eup %4503  ;;  %v3344_v48 = vadd.f32 1.0, %v4502_v58  ;;  %v4179_v0 = vpop.f32.mrb[14].mxu0  ;;  %4513 = vtanh.f32 %v3277_v38  ;;  %v3208_v62 = vmul.f32 %v3172_v52, %v5301_v36  ;;  %v4215_v23 = vadd.f32 %v2916_v47, %v5248_v4 }
 0x204   : > { %v4506_v39 = vpop.eup %4505  ;;  %v3342_v6 = vadd.f32 1.0, %v4504_v22  ;;  %v3173_v35 = vmul.f32 %v3137_v31, %v5309_v8  ;;  %v2919_v12 = vpop.f32.mrb[15].mxu0  ;;  %4515 = vtanh.f32 %v3275_v50  ;;  %v3206_v59 = vmul.f32 %v3170_v45, %v5304_v42 }
 0x205   : > { %v4508_v53 = vpop.eup %4507  ;;  %v3380_v14 = vmul.f32 %v3344_v48, %v3092_v29  ;;  %v3345_v26 = vadd.f32 1.0, %v4506_v39  ;;  %v3244_v19 = vadd.f32 %v3208_v62, %v5301_v36  ;;  %v3135_v25 = vmul.f32 0.044715, %v5325_v33 }
 0x206   : > { %v3378_v61 = vmul.f32 %v3342_v6, %v3090_v9  ;;  %v3343_v15 = vadd.f32 1.0, %v4508_v53  ;;  %v3209_v54 = vmul.f32 %v3173_v35, %v5309_v8  ;;  %v3242_v24 = vadd.f32 %v3206_v59, %v5304_v42 }
 0x207   : > { %3417 = vst.msk [vmem:[%s5330_s15 + $0x10] sm:$0xff] %vm3414_vm3, %v3380_v14  ;;  %v3381_v21 = vmul.f32 %v3345_v26, %v3093_v46  ;;  %v4214_v29 = vadd.f32 %v4178_v43, %v5246_v3  ;;  %v3280_v55 = vmul.f32 0.7978846, %v3244_v19  ;;  %v3171_v28 = vmul.f32 %v3135_v25, %v5325_v33 }
 0x208   : > { %3415 = vst.msk [vmem:[%s5330_s15] sm:$0xff] %vm3414_vm3, %v3378_v61  ;;  %v3379_v10 = vmul.f32 %v3343_v15, %v3091_v56  ;;  %v3245_v9 = vadd.f32 %v3209_v54, %v5309_v8  ;;  %v3278_v32 = vmul.f32 0.7978846, %v3242_v24  ;;  %v4216_v3 = vadd.f32 %v4179_v0, %v5250_v5 }
 0x209   : > { %v5346_v30 = vpop.f32.mrb[20].mxu1  ;;  %3418 = vst.msk [vmem:[%s5330_s15 + $0x18] sm:$0xff] %vm3414_vm3, %v3381_v21  ;;  %v5352_v27 = vadd.f32 %v4214_v29, %v5265_v18  ;;  %v4182_v1 = vpop.f32.mrb[16].mxu0  ;;  %4517 = vtanh.f32 %v3280_v55  ;;  %v5360_v46 = vadd.f32 %v4215_v23, %v5265_v18  ;;  %v4217_v63 = vadd.f32 %v2919_v12, %v5252_v11 }
 0x20a   : > { %v5355_v34 = vpop.f32.mrb[21].mxu1  ;;  %v4510_v37 = vpop.eup %4509  ;;  %3416 = vst.msk [vmem:[%s5330_s15 + $0x8] sm:$0xff] %vm3414_vm3, %v3379_v10  ;;  %v3281_v4 = vmul.f32 0.7978846, %v3245_v9  ;;  %v3097_v5 = vmul.f32 0.5, %v5286_v49  ;;  %4519 = vtanh.f32 %v3278_v32  ;;  %v3207_v51 = vmul.f32 %v3171_v28, %v5325_v33 }
 0x20b   : > { %v2932_v2 = vpop.f32.mrb[17].mxu0  ;;  %v5363_v56 = vpop.f32.mrb[22].mxu1  ;;  %v3348_v40 = vadd.f32 1.0, %v4510_v37  ;;  %v3095_v38 = vmul.f32 0.5, %v5289_v57  ;;  %v3140_v11 = vmul.f32 0.044715, %v5352_v27  ;;  %v5377_v22 = vadd.f32 %v4216_v3, %v5265_v18 }
 0x20c   : > { %v4512_v44 = vpop.eup %4511  ;;  %v4183_v60 = vpop.f32.mrb[18].mxu0  ;;  %4521 = vtanh.f32 %v3281_v4  ;;  %v3243_v49 = vadd.f32 %v3207_v51, %v5325_v33  ;;  %v3138_v47 = vmul.f32 0.044715, %v5360_v46  ;;  %v5382_v45 = vadd.f32 %v4217_v63, %v5265_v18 }
 0x20d   : > { %v5367_v43 = vpop.f32.mrb[23].mxu1  ;;  %v3346_v58 = vadd.f32 1.0, %v4512_v44  ;;  %v5371_v52 = vpop.f32.mrb[19].mxu0  ;;  %v3384_v31 = vmul.f32 %v3348_v40, %v5315_v41  ;;  %v3176_v57 = vmul.f32 %v3140_v11, %v5352_v27  ;;  %v4218_v0 = vadd.f32 %v4182_v1, %v5254_v7 }
 0x20e   : > { %v4514_v48 = vpop.eup %4513  ;;  %v3100_v6 = vmul.f32 0.5, %v5301_v36  ;;  %v3279_v62 = vmul.f32 0.7978846, %v3243_v49  ;;  %v3174_v35 = vmul.f32 %v3138_v47, %v5360_v46  ;;  %v3141_v14 = vmul.f32 0.044715, %v5377_v22 }
 0x20f   : > { %v3382_v50 = vmul.f32 %v3346_v58, %v5319_v20  ;;  %v4516_v39 = vpop.eup %4515  ;;  %3421 = vst.msk [vmem:[%s5330_s15 + $0x30] sm:$0xff] %vm3414_vm3, %v3384_v31  ;;  %v3349_v41 = vadd.f32 1.0, %v4514_v48  ;;  %v3098_v20 = vmul.f32 0.5, %v5304_v42  ;;  %v3212_v53 = vmul.f32 %v3176_v57, %v5352_v27 }
 0x210   : > { %v3347_v12 = vadd.f32 1.0, %v4516_v39  ;;  %4523 = vtanh.f32 %v3279_v62  ;;  %v3210_v59 = vmul.f32 %v3174_v35, %v5360_v46  ;;  %v3139_v36 = vmul.f32 0.044715, %v5382_v45 }
 0x211   : > { %3419 = vst.msk [vmem:[%s5330_s15 + $0x20] sm:$0xff] %vm3414_vm3, %v3382_v50  ;;  %v5394_v7 = vpop.f32.mrb[24].mxu1  ;;  %v3385_v26 = vmul.f32 %v3349_v41, %v3097_v5  ;;  %v4186_v61 = vpop.f32.mrb[20].mxu0  ;;  %v3248_v42 = vadd.f32 %v3212_v53, %v5352_v27  ;;  %v3177_v54 = vmul.f32 %v3141_v14, %v5377_v22  ;;  %v5403_v21 = vadd.f32 %v4218_v0, %v5265_v18 }
 0x212   : > { %v5398_v15 = vpop.f32.mrb[25].mxu1  ;;  %v3383_v19 = vmul.f32 %v3347_v12, %v3095_v38  ;;  %v5405_v24 = vpop.f32.mrb[21].mxu0  ;;  %v3246_v29 = vadd.f32 %v3210_v59, %v5360_v46  ;;  %v3175_v10 = vmul.f32 %v3139_v36, %v5382_v45  ;;  %v4219_v55 = vadd.f32 %v2932_v2, %v5256_v13 }
 0x213   : > { %v5407_v25 = vpop.f32.mrb[26].mxu1  ;;  %3422 = vst.msk [vmem:[%s5330_s15 + $0x38] sm:$0xff] %vm3414_vm3, %v3385_v26  ;;  %v4220_v9 = vadd.f32 %v4183_v60, %v5258_v16  ;;  %v4187_v23 = vpop.f32.mrb[22].mxu0  ;;  %v3101_v3 = vmul.f32 0.5, %v5309_v8  ;;  %v3284_v1 = vmul.f32 0.7978846, %v3248_v42  ;;  %v3213_v37 = vmul.f32 %v3177_v54, %v5377_v22 }
 0x214   : > { %v5415_v32 = vpop.f32.mrb[27].mxu1  ;;  %v4518_v28 = vpop.eup %4517  ;;  %3420 = vst.msk [vmem:[%s5330_s15 + $0x28] sm:$0xff] %vm3414_vm3, %v3383_v19  ;;  %v3144_v4 = vmul.f32 0.044715, %v5403_v21  ;;  %v3211_v16 = vmul.f32 %v3175_v10, %v5382_v45  ;;  %v5426_v2 = vadd.f32 %v4219_v55, %v5265_v18  ;;  %v3099_v49 = vmul.f32 0.5, %v5325_v33 }
 0x215   : > { %v5422_v63 = vpop.f32.mrb[23].mxu0  ;;  %v4520_v44 = vpop.eup %4519  ;;  %v3352_v40 = vadd.f32 1.0, %v4518_v28  ;;  %v3282_v13 = vmul.f32 0.7978846, %v3246_v29  ;;  %4525 = vtanh.f32 %v3284_v1  ;;  %v3249_v8 = vadd.f32 %v3213_v37, %v5377_v22 }
 0x216   : > { %v4522_v5 = vpop.eup %4521  ;;  %v3350_v51 = vadd.f32 1.0, %v4520_v44  ;;  %v3180_v60 = vmul.f32 %v3144_v4, %v5403_v21  ;;  %v3247_v11 = vadd.f32 %v3211_v16, %v5382_v45  ;;  %v3142_v39 = vmul.f32 0.044715, %v5426_v2 }
 0x217   : > { %v3388_v58 = vmul.f32 %v3352_v40, %v3100_v6  ;;  %v3353_v38 = vadd.f32 1.0, %v4522_v5  ;;  %4527 = vtanh.f32 %v3282_v13  ;;  %v3285_v47 = vmul.f32 0.7978846, %v3249_v8 }
 0x218   : > { %v3386_v31 = vmul.f32 %v3350_v51, %v3098_v20  ;;  %v3216_v48 = vmul.f32 %v3180_v60, %v5403_v21  ;;  %v3283_v0 = vmul.f32 0.7978846, %v3247_v11  ;;  %v5439_v41 = vadd.f32 %v4220_v9, %v5265_v18 }
 0x219   : > { %v5433_v50 = vpop.f32.mrb[28].mxu1  ;;  %3425 = vst.msk [vmem:[%s5330_s15 + $0x50] sm:$0xff] %vm3414_vm3, %v3388_v58  ;;  %v3389_v57 = vmul.f32 %v3353_v38, %v3101_v3  ;;  %v5441_v6 = vpop.f32.mrb[24].mxu0  ;;  %4529 = vtanh.f32 %v3285_v47  ;;  %v4221_v35 = vadd.f32 %v5371_v52, %v5260_v17  ;;  %v4222_v12 = vadd.f32 %v4186_v61, %v5346_v30 }
 0x21a   : > { %v5443_v62 = vpop.f32.mrb[29].mxu1  ;;  %3423 = vst.msk [vmem:[%s5330_s15 + $0x40] sm:$0xff] %vm3414_vm3, %v3386_v31  ;;  %v3252_v33 = vadd.f32 %v3216_v48, %v5403_v21  ;;  %v5451_v20 = vpop.f32.mrb[25].mxu0  ;;  %v3104_v26 = vmul.f32 0.5, %v5352_v27  ;;  %4531 = vtanh.f32 %v3283_v0  ;;  %v3178_v59 = vmul.f32 %v3142_v39, %v5426_v2 }
 0x21b   : > { %v5453_v53 = vpop.f32.mrb[30].mxu1  ;;  %v4524_v14 = vpop.eup %4523  ;;  %3426 = vst.msk [vmem:[%s5330_s15 + $0x58] sm:$0xff] %vm3414_vm3, %v3389_v57  ;;  %v3145_v36 = vmul.f32 0.044715, %v5439_v41  ;;  %v5465_v52 = vadd.f32 %v4221_v35, %v5265_v18  ;;  %v5468_v61 = vadd.f32 %v4222_v12, %v5265_v18  ;;  %v4223_v10 = vadd.f32 %v5405_v24, %v5355_v34 }
 0x21c   : > { %v5460_v19 = vpop.f32.mrb[26].mxu0  ;;  %v5462_v42 = vpop.f32.mrb[31].mxu1  ;;  %v3351_v17 = vadd.f32 1.0, %v4524_v14  ;;  %v3288_v30 = vmul.f32 0.7978846, %v3252_v33  ;;  %v3214_v27 = vmul.f32 %v3178_v59, %v5426_v2  ;;  %v4224_v55 = vadd.f32 %v4187_v23, %v5363_v56 }
 0x21d   : > { %v5470_v54 = vpop.f32.mrb[27].mxu0  ;;  %v3181_v29 = vmul.f32 %v3145_v36, %v5439_v41  ;;  %v3102_v28 = vmul.f32 0.5, %v5360_v46  ;;  %v3143_v3 = vmul.f32 0.044715, %v5465_v52  ;;  %v3105_v1 = vmul.f32 0.5, %v5377_v22 }
 0x21e   : > { %v3387_v9 = vmul.f32 %v3351_v17, %v3099_v49  ;;  %4533 = vtanh.f32 %v3288_v30  ;;  %v3250_v37 = vadd.f32 %v3214_v27, %v5426_v2  ;;  %v3148_v44 = vmul.f32 0.044715, %v5468_v61 }
 0x21f   : > { %v3217_v4 = vmul.f32 %v3181_v29, %v5439_v41  ;;  %v4526_v40 = vpop.eup %4525  ;;  %v3179_v34 = vmul.f32 %v3143_v3, %v5465_v52  ;;  %v5487_v56 = vadd.f32 %v4223_v10, %v5265_v18  ;;  %v5490_v46 = vadd.f32 %v4224_v55, %v5265_v18 }
 0x220   : > { %3424 = vst.msk [vmem:[%s5330_s15 + $0x48] sm:$0xff] %vm3414_vm3, %v3387_v9  ;;  %v4225_v22 = vadd.f32 %v5422_v63, %v5367_v43  ;;  %v3356_v13 = vadd.f32 1.0, %v4526_v40  ;;  %v3286_v16 = vmul.f32 0.7978846, %v3250_v37  ;;  %v3184_v51 = vmul.f32 %v3148_v44, %v5468_v61 }
 0x221   : > { %v5494_v24 = vpop.f32.mrb[32].mxu1  ;;  %v4528_v23 = vpop.eup %4527  ;;  %v3253_v5 = vadd.f32 %v3217_v4, %v5439_v41  ;;  %v3103_v38 = vmul.f32 0.5, %v5382_v45  ;;  %v3215_v11 = vmul.f32 %v3179_v34, %v5465_v52  ;;  %v3146_v43 = vmul.f32 0.044715, %v5487_v56 }
 0x222   : > { %v5498_v8 = vpop.f32.mrb[28].mxu0  ;;  %v5500_v60 = vpop.f32.mrb[33].mxu1  ;;  %v3354_v58 = vadd.f32 1.0, %v4528_v23  ;;  %v3392_v49 = vmul.f32 %v3356_v13, %v3104_v26  ;;  %4535 = vtanh.f32 %v3286_v16  ;;  %v3220_v48 = vmul.f32 %v3184_v51, %v5468_v61 }
 0x223   : > { %v5505_v63 = vpop.f32.mrb[29].mxu0  ;;  %v5507_v31 = vpop.f32.mrb[34].mxu1  ;;  %v3289_v47 = vmul.f32 0.7978846, %v3253_v5  ;;  %v3108_v33 = vmul.f32 0.5, %v5403_v21  ;;  %v3251_v35 = vadd.f32 %v3215_v11, %v5465_v52  ;;  %v3182_v12 = vmul.f32 %v3146_v43, %v5487_v56 }
 0x224   : > { %v5510_v57 = vpop.f32.mrb[30].mxu0  ;;  %v5512_v0 = vpop.f32.mrb[35].mxu1  ;;  %v3390_v39 = vmul.f32 %v3354_v58, %v3102_v28  ;;  %3429 = vst.msk [vmem:[%s5330_s15 + $0x70] sm:$0xff] %vm3414_vm3, %v3392_v49  ;;  %v3256_v36 = vadd.f32 %v3220_v48, %v5468_v61  ;;  %v3149_v17 = vmul.f32 0.044715, %v5490_v46  ;;  %v5527_v29 = vadd.f32 %v4225_v22, %v5265_v18 }
 0x225   : > { %v4530_v45 = vpop.eup %4529  ;;  %v5517_v14 = vpop.f32.mrb[31].mxu0  ;;  %4537 = vtanh.f32 %v3289_v47  ;;  %v3287_v21 = vmul.f32 0.7978846, %v3251_v35  ;;  %v3218_v27 = vmul.f32 %v3182_v12, %v5487_v56  ;;  %v4226_v28 = vadd.f32 %v5441_v6, %v5394_v7 }
 0x226   : > { %v4532_v26 = vpop.eup %4531  ;;  %v3357_v59 = vadd.f32 1.0, %v4530_v45  ;;  %3427 = vst.msk [vmem:[%s5330_s15 + $0x60] sm:$0xff] %vm3414_vm3, %v3390_v39  ;;  %v3292_v55 = vmul.f32 0.7978846, %v3256_v36  ;;  %v3185_v9 = vmul.f32 %v3149_v17, %v5490_v46  ;;  %v3106_v4 = vmul.f32 0.5, %v5426_v2 }
 0x227   : > { %v3355_v30 = vadd.f32 1.0, %v4532_v26  ;;  %4539 = vtanh.f32 %v3287_v21  ;;  %v3254_v44 = vadd.f32 %v3218_v27, %v5487_v56  ;;  %v5543_v6 = vadd.f32 %v4226_v28, %v5265_v18 }
 0x228   : > { %v3393_v10 = vmul.f32 %v3357_v59, %v3105_v1  ;;  %v4534_v3 = vpop.eup %4533  ;;  %4541 = vtanh.f32 %v3292_v55  ;;  %v3221_v34 = vmul.f32 %v3185_v9, %v5490_v46  ;;  %v3147_v1 = vmul.f32 0.044715, %v5527_v29 }
 0x229   : > { %v3391_v37 = vmul.f32 %v3355_v30, %v3103_v38  ;;  %v3360_v40 = vadd.f32 1.0, %v4534_v3  ;;  %v5538_v22 = vpop.f32.mrb[32].mxu0  ;;  %v3290_v7 = vmul.f32 0.7978846, %v3254_v44  ;;  %v4227_v2 = vadd.f32 %v5451_v20, %v5398_v15 }
 0x22a   : > { %3430 = vst.msk [vmem:[%s5330_s15 + $0x78] sm:$0xff] %vm3414_vm3, %v3393_v10  ;;  %v4228_v23 = vadd.f32 %v5460_v19, %v5407_v25  ;;  %v5549_v13 = vpop.f32.mrb[33].mxu0  ;;  %v3257_v5 = vadd.f32 %v3221_v34, %v5490_v46  ;;  %v3183_v51 = vmul.f32 %v3147_v1, %v5527_v29  ;;  %v4229_v58 = vadd.f32 %v5470_v54, %v5415_v32 }
 0x22b   : > { %3428 = vst.msk [vmem:[%s5330_s15 + $0x68] sm:$0xff] %vm3414_vm3, %v3391_v37  ;;  %v3396_v16 = vmul.f32 %v3360_v40, %v3108_v33  ;;  %v5555_v38 = vpop.f32.mrb[34].mxu0  ;;  %v3109_v11 = vmul.f32 0.5, %v5439_v41  ;;  %4543 = vtanh.f32 %v3290_v7  ;;  %v3152_v15 = vmul.f32 0.044715, %v5543_v6 }
 0x22c   : > { %v5560_v20 = vadd.f32 %v4227_v2, %v5265_v18  ;;  %v5562_v25 = vpop.f32.mrb[35].mxu0  ;;  %v4536_v19 = vpop.eup %4535  ;;  %v3293_v43 = vmul.f32 0.7978846, %v3257_v5  ;;  %v3219_v49 = vmul.f32 %v3183_v51, %v5527_v29  ;;  %v5568_v32 = vadd.f32 %v4228_v23, %v5265_v18 }
 0x22d   : > { %3433 = vst.msk [vmem:[%s5330_s15 + $0x90] sm:$0xff] %vm3414_vm3, %v3396_v16  ;;  %v5571_v54 = vadd.f32 %v4229_v58, %v5265_v18  ;;  %v3358_v41 = vadd.f32 1.0, %v4536_v19  ;;  %v3107_v47 = vmul.f32 0.5, %v5465_v52  ;;  %v3188_v48 = vmul.f32 %v3152_v15, %v5543_v6 }
 0x22e   : > { %v3150_v45 = vmul.f32 0.044715, %v5560_v20  ;;  %v3112_v33 = vmul.f32 0.5, %v5468_v61  ;;  %4545 = vtanh.f32 %v3293_v43  ;;  %v3255_v35 = vadd.f32 %v3219_v49, %v5527_v29 }
 0x22f   : > { %v4538_v39 = vpop.eup %4537  ;;  %v3153_v12 = vmul.f32 0.044715, %v5568_v32  ;;  %v3394_v26 = vmul.f32 %v3358_v41, %v3106_v4  ;;  %v3224_v36 = vmul.f32 %v3188_v48, %v5543_v6  ;;  %v3110_v52 = vmul.f32 0.5, %v5487_v56 }
 0x230   : > { %v3361_v59 = vadd.f32 1.0, %v4538_v39  ;;  %v3186_v17 = vmul.f32 %v3150_v45, %v5560_v20  ;;  %v3291_v30 = vmul.f32 0.7978846, %v3255_v35  ;;  %v3151_v27 = vmul.f32 0.044715, %v5571_v54 }
 0x231   : > { %v3189_v21 = vmul.f32 %v3153_v12, %v5568_v32  ;;  %v4540_v61 = vpop.eup %4539  ;;  %3431 = vst.msk [vmem:[%s5330_s15 + $0x80] sm:$0xff] %vm3414_vm3, %v3394_v26  ;;  %v3260_v55 = vadd.f32 %v3224_v36, %v5543_v6  ;;  %v4230_v28 = vadd.f32 %v5498_v8, %v5433_v50  ;;  %v4231_v2 = vadd.f32 %v5505_v63, %v5443_v62 }
 0x232   : > { %v3397_v10 = vmul.f32 %v3361_v59, %v3109_v11  ;;  %v3222_v9 = vmul.f32 %v3186_v17, %v5560_v20  ;;  %v4542_v3 = vpop.eup %4541  ;;  %v3359_v37 = vadd.f32 1.0, %v4540_v61  ;;  %4547 = vtanh.f32 %v3291_v30 }
 0x233   : > { %v3225_v56 = vmul.f32 %v3189_v21, %v5568_v32  ;;  %v3187_v4 = vmul.f32 %v3151_v27, %v5571_v54  ;;  %v3364_v44 = vadd.f32 1.0, %v4542_v3  ;;  %v3296_v40 = vmul.f32 0.7978846, %v3260_v55 }
 0x234   : > { %3434 = vst.msk [vmem:[%s5330_s15 + $0x98] sm:$0xff] %vm3414_vm3, %v3397_v10  ;;  %v3258_v34 = vadd.f32 %v3222_v9, %v5560_v20  ;;  %v5596_v1 = vadd.f32 %v4230_v28, %v5265_v18  ;;  %v3395_v7 = vmul.f32 %v3359_v37, %v3107_v47  ;;  %v3113_v5 = vmul.f32 0.5, %v5490_v46 }
 0x235   : > { %v3261_v50 = vadd.f32 %v3225_v56, %v5568_v32  ;;  %v3223_v8 = vmul.f32 %v3187_v4, %v5571_v54  ;;  %v4544_v23 = vpop.eup %4543  ;;  %v3400_v16 = vmul.f32 %v3364_v44, %v3112_v33  ;;  %4549 = vtanh.f32 %v3296_v40 }
 0x236   : > { %v3294_v51 = vmul.f32 0.7978846, %v3258_v34  ;;  %3432 = vst.msk [vmem:[%s5330_s15 + $0x88] sm:$0xff] %vm3414_vm3, %v3395_v7  ;;  %v3362_v58 = vadd.f32 1.0, %v4544_v23  ;;  %v3156_v19 = vmul.f32 0.044715, %v5596_v1  ;;  %v5610_v62 = vadd.f32 %v4231_v2, %v5265_v18 }
 0x237   : > { %v3297_v11 = vmul.f32 0.7978846, %v3261_v50  ;;  %v3259_v15 = vadd.f32 %v3223_v8, %v5571_v54  ;;  %3437 = vst.msk [vmem:[%s5330_s15 + $0xb0] sm:$0xff] %vm3414_vm3, %v3400_v16  ;;  %v4232_v46 = vadd.f32 %v5510_v57, %v5453_v53  ;;  %v4233_v63 = vadd.f32 %v5517_v14, %v5462_v42 }
 0x238   : > { %4551 = vtanh.f32 %v3294_v51  ;;  %v4546_v43 = vpop.eup %4545  ;;  %v3398_v49 = vmul.f32 %v3362_v58, %v3110_v52  ;;  %v3192_v47 = vmul.f32 %v3156_v19, %v5596_v1  ;;  %v3111_v45 = vmul.f32 0.5, %v5527_v29 }
 0x239   : > { %4553 = vtanh.f32 %v3297_v11  ;;  %v3295_v41 = vmul.f32 0.7978846, %v3259_v15  ;;  %v3365_v48 = vadd.f32 1.0, %v4546_v43  ;;  %v3154_v39 = vmul.f32 0.044715, %v5610_v62 }
 0x23a   : > { %v5620_v33 = vadd.f32 %v4232_v46, %v5265_v18  ;;  %3435 = vst.msk [vmem:[%s5330_s15 + $0xa0] sm:$0xff] %vm3414_vm3, %v3398_v49  ;;  %v3228_v53 = vmul.f32 %v3192_v47, %v5596_v1  ;;  %v5626_v42 = vadd.f32 %v4233_v63, %v5265_v18  ;;  %v4234_v57 = vadd.f32 %v5538_v22, %v5494_v24 }
 0x23b   : > { %4555 = vtanh.f32 %v3295_v41  ;;  %v3401_v14 = vmul.f32 %v3365_v48, %v3113_v5  ;;  %v3116_v29 = vmul.f32 0.5, %v5543_v6  ;;  %v3190_v35 = vmul.f32 %v3154_v39, %v5610_v62 }
 0x23c   : > { %v3157_v12 = vmul.f32 0.044715, %v5620_v33  ;;  %v4548_v26 = vpop.eup %4547  ;;  %v3114_v59 = vmul.f32 0.5, %v5560_v20  ;;  %v3264_v36 = vadd.f32 %v3228_v53, %v5596_v1  ;;  %v3155_v17 = vmul.f32 0.044715, %v5626_v42 }
 0x23d   : > { %v5637_v52 = vadd.f32 %v4234_v57, %v5265_v18  ;;  %3438 = vst.msk [vmem:[%s5330_s15 + $0xb8] sm:$0xff] %vm3414_vm3, %v3401_v14  ;;  %v3363_v24 = vadd.f32 1.0, %v4548_v26  ;;  %v3226_v22 = vmul.f32 %v3190_v35, %v5610_v62  ;;  %v4235_v30 = vadd.f32 %v5549_v13, %v5500_v60 }
 0x23e   : > { %v3193_v6 = vmul.f32 %v3157_v12, %v5620_v33  ;;  %v3117_v20 = vmul.f32 0.5, %v5568_v32  ;;  %v3300_v21 = vmul.f32 0.7978846, %v3264_v36  ;;  %v3191_v27 = vmul.f32 %v3155_v17, %v5626_v42 }
 0x23f   : > { %v3160_v61 = vmul.f32 0.044715, %v5637_v52  ;;  %v4550_v10 = vpop.eup %4549  ;;  %v3399_v55 = vmul.f32 %v3363_v24, %v3111_v45  ;;  %v3262_v9 = vadd.f32 %v3226_v22, %v5610_v62  ;;  %v5651_v3 = vadd.f32 %v4235_v30, %v5265_v18 }
 0x240   : > { %v3229_v28 = vmul.f32 %v3193_v6, %v5620_v33  ;;  %v3368_v37 = vadd.f32 1.0, %v4550_v10  ;;  %4557 = vtanh.f32 %v3300_v21  ;;  %v3227_v60 = vmul.f32 %v3191_v27, %v5626_v42 }
 0x241   : > { %v3196_v13 = vmul.f32 %v3160_v61, %v5637_v52  ;;  %3436 = vst.msk [vmem:[%s5330_s15 + $0xa8] sm:$0xff] %vm3414_vm3, %v3399_v55  ;;  %v3115_v56 = vmul.f32 0.5, %v5571_v54  ;;  %v3298_v4 = vmul.f32 0.7978846, %v3262_v9  ;;  %v3158_v40 = vmul.f32 0.044715, %v5651_v3 }
 0x242   : > { %v4552_v32 = vpop.eup %4551  ;;  %v3265_v44 = vadd.f32 %v3229_v28, %v5620_v33  ;;  %v3404_v7 = vmul.f32 %v3368_v37, %v3116_v29  ;;  %v3263_v8 = vadd.f32 %v3227_v60, %v5626_v42  ;;  %v4236_v15 = vadd.f32 %v5555_v38, %v5507_v31 }
 0x243   : > { %v4554_v34 = vpop.eup %4553  ;;  %v3366_v50 = vadd.f32 1.0, %v4552_v32  ;;  %v3232_v2 = vmul.f32 %v3196_v13, %v5637_v52  ;;  %4559 = vtanh.f32 %v3298_v4  ;;  %v3194_v5 = vmul.f32 %v3158_v40, %v5651_v3 }
 0x244   : > { %v3369_v23 = vadd.f32 1.0, %v4554_v34  ;;  %v3301_v16 = vmul.f32 0.7978846, %v3265_v44  ;;  %3441 = vst.msk [vmem:[%s5330_s15 + $0xd0] sm:$0xff] %vm3414_vm3, %v3404_v7  ;;  %v3299_v58 = vmul.f32 0.7978846, %v3263_v8  ;;  %v3089_v49 = vadd.f32 %v4236_v15, %v5265_v18 }
 0x245   : > { %v4556_v54 = vpop.eup %4555  ;;  %v3402_v51 = vmul.f32 %v3366_v50, %v3114_v59  ;;  %v3268_v11 = vadd.f32 %v3232_v2, %v5637_v52  ;;  %v3230_v63 = vmul.f32 %v3194_v5, %v5651_v3  ;;  %v4237_v41 = vadd.f32 %v5562_v25, %v5512_v0 }
 0x246   : > { %v3405_v19 = vmul.f32 %v3369_v23, %v3117_v20  ;;  %v3367_v46 = vadd.f32 1.0, %v4556_v54  ;;  %4561 = vtanh.f32 %v3301_v16  ;;  %v3161_v38 = vmul.f32 0.044715, %v3089_v49 }
 0x247   : > { %3439 = vst.msk [vmem:[%s5330_s15 + $0xc0] sm:$0xff] %vm3414_vm3, %v3402_v51  ;;  %4563 = vtanh.f32 %v3299_v58  ;;  %v3304_v43 = vmul.f32 0.7978846, %v3268_v11  ;;  %v3266_v31 = vadd.f32 %v3230_v63, %v5651_v3  ;;  %v3087_v48 = vadd.f32 %v4237_v41, %v5265_v18 }
 0x248   : > { %3442 = vst.msk [vmem:[%s5330_s15 + $0xd8] sm:$0xff] %vm3414_vm3, %v3405_v19  ;;  %v3403_v47 = vmul.f32 %v3367_v46, %v3115_v56  ;;  %v3197_v53 = vmul.f32 %v3161_v38, %v3089_v49  ;;  %v3120_v14 = vmul.f32 0.5, %v5596_v1  ;;  %v3118_v26 = vmul.f32 0.5, %v5610_v62 }
 0x249   : > { %4565 = vtanh.f32 %v3304_v43  ;;  %v3302_v45 = vmul.f32 0.7978846, %v3266_v31  ;;  %v3159_v57 = vmul.f32 0.044715, %v3087_v48  ;;  %v3121_v24 = vmul.f32 0.5, %v5620_v33 }
 0x24a   : > { %3440 = vst.msk [vmem:[%s5330_s15 + $0xc8] sm:$0xff] %vm3414_vm3, %v3403_v47  ;;  %v4558_v39 = vpop.eup %4557  ;;  %v3233_v0 = vmul.f32 %v3197_v53, %v3089_v49  ;;  %v3119_v21 = vmul.f32 0.5, %v5626_v42  ;;  %v3124_v33 = vmul.f32 0.5, %v5637_v52  ;;  %v3122_v37 = vmul.f32 0.5, %v5651_v3 }
 0x24b   : > { %v3372_v29 = vadd.f32 1.0, %v4558_v39  ;;  %4567 = vtanh.f32 %v3302_v45  ;;  %v3195_v25 = vmul.f32 %v3159_v57, %v3087_v48  ;;  %v3125_v52 = vmul.f32 0.5, %v3089_v49 }
 0x24c   : > { %v3269_v18 = vadd.f32 %v3233_v0, %v3089_v49  ;;  %v3123_v40 = vmul.f32 0.5, %v3087_v48 }
 0x24d   : > { %v4560_v35 = vpop.eup %4559  ;;  %v3408_v12 = vmul.f32 %v3372_v29, %v3120_v14  ;;  %v3231_v36 = vmul.f32 %v3195_v25, %v3087_v48 }
 0x24e   : > { %v3370_v59 = vadd.f32 1.0, %v4560_v35  ;;  %v3305_v30 = vmul.f32 0.7978846, %v3269_v18 }
 0x24f   : > { %3445 = vst.msk [vmem:[%s5330_s15 + $0xf0] sm:$0xff] %vm3414_vm3, %v3408_v12  ;;  %v3267_v20 = vadd.f32 %v3231_v36, %v3087_v48 }
 0x250   : > { %v4562_v17 = vpop.eup %4561  ;;  %v3406_v1 = vmul.f32 %v3370_v59, %v3118_v26  ;;  %4569 = vtanh.f32 %v3305_v30 }
 0x251   : > { %v4564_v22 = vpop.eup %4563  ;;  %v3373_v6 = vadd.f32 1.0, %v4562_v17  ;;  %v3303_v10 = vmul.f32 0.7978846, %v3267_v20 }
 0x252   : > { %v3371_v27 = vadd.f32 1.0, %v4564_v22  ;;  %3443 = vst.msk [vmem:[%s5330_s15 + $0xe0] sm:$0xff] %vm3414_vm3, %v3406_v1 }
 0x253   : > { %v4566_v62 = vpop.eup %4565  ;;  %v3409_v61 = vmul.f32 %v3373_v6, %v3121_v24  ;;  %4571 = vtanh.f32 %v3303_v10 }
 0x254   : > { %v3407_v55 = vmul.f32 %v3371_v27, %v3119_v21  ;;  %v3376_v9 = vadd.f32 1.0, %v4566_v62 }
 0x255   : > { %3446 = vst.msk [vmem:[%s5330_s15 + $0xf8] sm:$0xff] %vm3414_vm3, %v3409_v61  ;;  %v4568_v28 = vpop.eup %4567 }
 0x256   : > { %3444 = vst.msk [vmem:[%s5330_s15 + $0xe8] sm:$0xff] %vm3414_vm3, %v3407_v55  ;;  %v3412_v42 = vmul.f32 %v3376_v9, %v3124_v33  ;;  %v3374_v60 = vadd.f32 1.0, %v4568_v28 }
 0x258   : > { %3449 = vst.msk [vmem:[%s5330_s15 + $0x110] sm:$0xff] %vm3414_vm3, %v3412_v42  ;;  %v3410_v13 = vmul.f32 %v3374_v60, %v3122_v37 }
 0x25a   : > { %3447 = vst.msk [vmem:[%s5330_s15 + $0x100] sm:$0xff] %vm3414_vm3, %v3410_v13  ;;  %v4570_v32 = vpop.eup %4569 }
 0x25b   : > { %v3377_v56 = vadd.f32 1.0, %v4570_v32 }
 0x25d   : > { %v4572_v4 = vpop.eup %4571  ;;  %v3413_v44 = vmul.f32 %v3377_v56, %v3125_v52 }
 0x25e   : > { %v3375_v34 = vadd.f32 1.0, %v4572_v4 }
 0x25f   : > { %3451 = vst.msk [vmem:[%s5330_s15 + $0x118] sm:$0x3f] %vm3450_vm4, %v3413_v44 }
 0x260   : > { %v3411_v7 = vmul.f32 %v3375_v34, %v3123_v40 }
 0x262   : > { %3448 = vst.msk [vmem:[%s5330_s15 + $0x108] sm:$0xff] %vm3414_vm3, %v3411_v7 }
 0x263 PF: > { %s13_s12 = sadd.s32 1, %s4579_s12  }
 0x264   : > { %p10_p4 = scmp.ge.s32.totalorder %s13_s12, 4  }
 0x266   :  { %12 = sbr.rel (!%p10_p4) target bundleno = 1 (0x1), region = 70 }

</bundles_post_ra>
